<compile_context>
chip_gen: v7x
topology: tpu7x:2x2x1
jax: 0.10.0
libtpu: 0.0.40
codegen_flags: <defaults>
</compile_context>

<pallas_src>
import functools

import jax
import jax.numpy as jnp
from jax import lax
from jax.experimental import pallas as pl
from jax.experimental.pallas import tpu as pltpu


def _gn_silu_conv3x3_kernel(x_ref, w_ref, b_ref, gamma_ref, beta_ref,
                            mgc_ref, mcg_ref, mask_ref, o_ref, pad_ref,
                            *, H, W, Cin, G, eps):
    HW = H * W
    x = x_ref[0]                                   # (Cin, HW) f32, lane-dense

    # ---- GroupNorm statistics (per group of Cin//G channels) ----
    s1 = jnp.sum(x, axis=1, keepdims=True)         # (Cin, 1) per-channel sum
    s2 = jnp.sum(x * x, axis=1, keepdims=True)     # (Cin, 1) per-channel sum sq
    mgc = mgc_ref[...]                             # (G, Cin) one-hot membership
    mcg = mcg_ref[...]                             # (Cin, G) its transpose
    inv_cnt = 1.0 / float(HW * (Cin // G))
    mean_g = jnp.dot(mgc, s1, preferred_element_type=jnp.float32) * inv_cnt
    msq_g = jnp.dot(mgc, s2, preferred_element_type=jnp.float32) * inv_cnt
    var_g = msq_g - mean_g * mean_g                # biased variance (PyTorch GN)
    inv_g = lax.rsqrt(var_g + eps)                 # (G, 1)
    mean_c = jnp.dot(mcg, mean_g, preferred_element_type=jnp.float32)  # (Cin,1)
    inv_c = jnp.dot(mcg, inv_g, preferred_element_type=jnp.float32)    # (Cin,1)

    scale = gamma_ref[...] * inv_c                 # (Cin, 1)
    shift = beta_ref[...] - mean_c * scale         # (Cin, 1)
    a = x * scale + shift                          # normalize + per-channel affine

    # ---- SiLU ----
    a = a * (1.0 / (1.0 + jnp.exp(-a)))

    # ---- 3x3 conv (padding=1) as one im2col matmul ----
    # Zero-pad the flattened spatial axis by (W+1) on each side so every tap
    # offset d in [-(W+1), W+1] becomes a static, in-bounds lane slice.
    off = W + 1
    pad_ref[...] = jnp.zeros_like(pad_ref)
    pad_ref[:, off:off + HW] = a

    patches = []
    t = 0
    for kh in range(3):
        dh = kh - 1
        for kw in range(3):
            dw = kw - 1
            d = dh * W + dw
            if d == 0:
                patches.append(a)                  # center tap: no shift, no mask
            else:
                # Shifted tap; the 0/1 mask zeroes positions whose source pixel
                # lies outside the image (handles the row-wrap of the flat shift).
                patches.append(pad_ref[:, off + d:off + d + HW] * mask_ref[t])
            t += 1
    col = jnp.concatenate(patches, axis=0)         # (9*Cin, HW)

    out = jnp.dot(w_ref[...], col, preferred_element_type=jnp.float32)  # (Cout, HW)
    o_ref[0] = (out + b_ref[...]).astype(o_ref.dtype)


def output_layer_forward(x_nchw, conv_w_oihw, conv_b, gn_gamma, gn_beta,
                         *, num_groups=32, eps=1e-5):
    """GroupNorm(num_groups) -> SiLU -> Conv2d(3x3, padding=1). NCHW in/out."""
    N, Cin, H, W = x_nchw.shape
    Cout = conv_w_oihw.shape[0]
    G = num_groups
    assert Cin % G == 0, "GroupNorm requires in_channels % num_groups == 0"
    HW = H * W

    # Free (metadata-only) reshape: flattened spatial becomes the lane dim.
    x_flat = x_nchw.reshape(N, Cin, HW)

    # Conv weight as one (Cout, 9*Cin) im2col matrix, tap-major then Cin.
    w2 = jnp.transpose(conv_w_oihw, (0, 2, 3, 1)).reshape(Cout, 9 * Cin)
    w2 = w2.astype(jnp.float32)
    b2 = conv_b.reshape(Cout, 1).astype(jnp.float32)
    g2 = gn_gamma.reshape(Cin, 1).astype(jnp.float32)
    be2 = gn_beta.reshape(Cin, 1).astype(jnp.float32)

    # One-hot group membership (G, Cin) and its transpose (Cin, G).
    ch_group = jnp.arange(Cin, dtype=jnp.int32) // (Cin // G)
    m_gc = (jnp.arange(G, dtype=jnp.int32)[:, None] == ch_group[None, :])
    m_gc = m_gc.astype(jnp.float32)
    m_cg = m_gc.T

    # Per-tap 0/1 border masks over the flattened spatial axis: (9, 1, HW).
    hh = jnp.arange(H)
    ww = jnp.arange(W)
    rows = []
    for kh in range(3):
        dh = kh - 1
        for kw in range(3):
            dw = kw - 1
            vh = (hh + dh >= 0) & (hh + dh <= H - 1)
            vw = (ww + dw >= 0) & (ww + dw <= W - 1)
            rows.append((vh[:, None] & vw[None, :]).reshape(1, HW))
    tap_mask = jnp.stack(rows, axis=0).astype(jnp.float32)   # (9, 1, HW)

    kernel = functools.partial(_gn_silu_conv3x3_kernel,
                               H=H, W=W, Cin=Cin, G=G, eps=eps)

    out_flat = pl.pallas_call(
        kernel,
        out_shape=jax.ShapeDtypeStruct((N, Cout, HW), x_nchw.dtype),
        grid_spec=pltpu.PrefetchScalarGridSpec(
            num_scalar_prefetch=0,
            grid=(N,),
            in_specs=[
                pl.BlockSpec((1, Cin, HW), lambda n: (n, 0, 0)),     # x
                pl.BlockSpec((Cout, 9 * Cin), lambda n: (0, 0)),     # conv weight
                pl.BlockSpec((Cout, 1), lambda n: (0, 0)),           # conv bias
                pl.BlockSpec((Cin, 1), lambda n: (0, 0)),            # gn gamma
                pl.BlockSpec((Cin, 1), lambda n: (0, 0)),            # gn beta
                pl.BlockSpec((G, Cin), lambda n: (0, 0)),            # group one-hot
                pl.BlockSpec((Cin, G), lambda n: (0, 0)),            # its transpose
                pl.BlockSpec((9, 1, HW), lambda n: (0, 0, 0)),       # tap masks
            ],
            out_specs=pl.BlockSpec((1, Cout, HW), lambda n: (n, 0, 0)),
            scratch_shapes=[
                pltpu.VMEM((Cin, HW + 2 * (W + 1)), jnp.float32),    # padded acts
            ],
        ),
        compiler_params=pltpu.CompilerParams(
            dimension_semantics=("parallel",),
            vmem_limit_bytes=32 * 1024 * 1024,
        ),
    )(x_flat, w2, b2, g2, be2, m_gc, m_cg, tap_mask)

    return out_flat.reshape(N, Cout, H, W)          # free reshape back to NCHW


def _reference(x, conv_w, conv_b, gamma, beta, *, num_groups=32, eps=1e-5):
    """Pure-JAX reference: GroupNorm -> SiLU -> Conv2d(3x3, padding=1)."""
    N, C, H, W = x.shape
    G = num_groups
    xg = x.reshape(N, G, C // G, H, W)
    mean = jnp.mean(xg, axis=(2, 3, 4), keepdims=True)
    var = jnp.var(xg, axis=(2, 3, 4), keepdims=True)
    xn = ((xg - mean) / jnp.sqrt(var + eps)).reshape(N, C, H, W)
    xn = xn * gamma.reshape(1, C, 1, 1) + beta.reshape(1, C, 1, 1)
    a = xn * jax.nn.sigmoid(xn)
    y = lax.conv_general_dilated(
        a, conv_w, window_strides=(1, 1), padding=((1, 1), (1, 1)),
        dimension_numbers=("NCHW", "OIHW", "NCHW"),
        precision=lax.Precision.HIGHEST)
    return y + conv_b.reshape(1, -1, 1, 1)


if __name__ == "__main__":
    key = jax.random.PRNGKey(0)
    k_x, k_w, k_b, k_g, k_be = jax.random.split(key, 5)

    # GroupNorm(32, Cin) requires Cin % 32 == 0, so use Cin=64, Cout=4.
    N, Cin, Cout, H, W = 2, 64, 4, 16, 16
    x = jax.random.normal(k_x, (N, Cin, H, W), dtype=jnp.float32)

    fan_in = Cin * 3 * 3
    bound = 1.0 / (fan_in ** 0.5)
    conv_w = jax.random.uniform(k_w, (Cout, Cin, 3, 3), jnp.float32, -bound, bound)
    conv_b = jax.random.uniform(k_b, (Cout,), jnp.float32, -bound, bound)
    gamma = 1.0 + 0.1 * jax.random.normal(k_g, (Cin,), dtype=jnp.float32)
    beta = 0.1 * jax.random.normal(k_be, (Cin,), dtype=jnp.float32)

    out = output_layer_forward(x, conv_w, conv_b, gamma, beta, num_groups=32)
    out = jax.block_until_ready(out)

    ref = _reference(x, conv_w, conv_b, gamma, beta, num_groups=32)
    assert out.shape == (N, Cout, H, W), out.shape
    # Tolerance covers possible reduced-precision (bf16-pass) MXU handling of
    # f32 operands; any real indexing / normalization bug would show up as O(1)
    # errors and still be caught.
    assert jnp.allclose(out, ref, atol=2e-2, rtol=2e-2), \
        float(jnp.max(jnp.abs(out - ref)))

    print("KERNEL_OK")
</pallas_src>

<mosaic_0001>
module attributes {stable_mosaic.version = 11 : i64} {
  func.func @_gn_silu_conv3x3_kernel(%arg0: i32, %arg1: memref<1x64x256xf32, #tpu.memory_space<vmem>>, %arg2: memref<4x576xf32, #tpu.memory_space<vmem>>, %arg3: memref<4x1xf32, #tpu.memory_space<vmem>>, %arg4: memref<64x1xf32, #tpu.memory_space<vmem>>, %arg5: memref<64x1xf32, #tpu.memory_space<vmem>>, %arg6: memref<32x64xf32, #tpu.memory_space<vmem>>, %arg7: memref<64x32xf32, #tpu.memory_space<vmem>>, %arg8: memref<9x1x256xf32, #tpu.memory_space<vmem>>, %arg9: memref<1x4x256xf32, #tpu.memory_space<vmem>>, %arg10: memref<64x290xf32, #tpu.memory_space<vmem>>) attributes {dimension_semantics = [#tpu.dimension_semantics<parallel>], iteration_bounds = array<i64: 2>, scalar_prefetch = 0 : i64, scratch_operands = 1 : i64, tpu.core_type = #tpu.core_type<tc>, window_params = [{transform_indices = @transform_0, window_bounds = array<i64: 1, 64, 256>}, {pipeline_mode = #tpu.pipeline_mode<synchronous>, transform_indices = @transform_1, window_bounds = array<i64: 4, 576>}, {pipeline_mode = #tpu.pipeline_mode<synchronous>, transform_indices = @transform_2, window_bounds = array<i64: 4, 1>}, {pipeline_mode = #tpu.pipeline_mode<synchronous>, transform_indices = @transform_3, window_bounds = array<i64: 64, 1>}, {pipeline_mode = #tpu.pipeline_mode<synchronous>, transform_indices = @transform_4, window_bounds = array<i64: 64, 1>}, {pipeline_mode = #tpu.pipeline_mode<synchronous>, transform_indices = @transform_5, window_bounds = array<i64: 32, 64>}, {pipeline_mode = #tpu.pipeline_mode<synchronous>, transform_indices = @transform_6, window_bounds = array<i64: 64, 32>}, {pipeline_mode = #tpu.pipeline_mode<synchronous>, transform_indices = @transform_7, window_bounds = array<i64: 9, 1, 256>}, {transform_indices = @transform_8, window_bounds = array<i64: 1, 4, 256>}]} {
    %c0 = arith.constant 0 : index
    %c0_0 = arith.constant 0 : index
    %c0_1 = arith.constant 0 : index
    %0 = vector.load %arg1[%c0, %c0_0, %c0_1] : memref<1x64x256xf32, #tpu.memory_space<vmem>>, vector<1x64x256xf32>
    %1 = vector.shape_cast %0 : vector<1x64x256xf32> to vector<64x256xf32>
    %cst = arith.constant dense<0.000000e+00> : vector<64xf32>
    %2 = vector.multi_reduction <add>, %1, %cst [1] : vector<64x256xf32> to vector<64xf32>
    %3 = vector.shape_cast %2 : vector<64xf32> to vector<64x1xf32>
    %4 = arith.mulf %1, %1 : vector<64x256xf32>
    %cst_2 = arith.constant dense<0.000000e+00> : vector<64xf32>
    %5 = vector.multi_reduction <add>, %4, %cst_2 [1] : vector<64x256xf32> to vector<64xf32>
    %6 = vector.shape_cast %5 : vector<64xf32> to vector<64x1xf32>
    %c0_3 = arith.constant 0 : index
    %c0_4 = arith.constant 0 : index
    %7 = vector.load %arg6[%c0_3, %c0_4] : memref<32x64xf32, #tpu.memory_space<vmem>>, vector<32x64xf32>
    %c0_5 = arith.constant 0 : index
    %c0_6 = arith.constant 0 : index
    %8 = vector.load %arg7[%c0_5, %c0_6] : memref<64x32xf32, #tpu.memory_space<vmem>>, vector<64x32xf32>
    %cst_7 = arith.constant dense<0.000000e+00> : vector<32x1xf32>
    %9 = tpu.matmul %7, %3, %cst_7 {dimension_numbers = #tpu.dot_dimension_numbers<[1], [0], [0], [1], [0, 0, 1, 1], [], []>} : vector<32x64xf32>, vector<64x1xf32>, vector<32x1xf32> -> vector<32x1xf32>
    %cst_8 = arith.constant 0.001953125 : f32
    %10 = vector.broadcast %cst_8 : f32 to vector<32x1xf32>
    %11 = arith.mulf %9, %10 : vector<32x1xf32>
    %cst_9 = arith.constant dense<0.000000e+00> : vector<32x1xf32>
    %12 = tpu.matmul %7, %6, %cst_9 {dimension_numbers = #tpu.dot_dimension_numbers<[1], [0], [0], [1], [0, 0, 1, 1], [], []>} : vector<32x64xf32>, vector<64x1xf32>, vector<32x1xf32> -> vector<32x1xf32>
    %cst_10 = arith.constant 0.001953125 : f32
    %13 = vector.broadcast %cst_10 : f32 to vector<32x1xf32>
    %14 = arith.mulf %12, %13 : vector<32x1xf32>
    %15 = arith.mulf %11, %11 : vector<32x1xf32>
    %16 = arith.subf %14, %15 : vector<32x1xf32>
    %cst_11 = arith.constant 9.99999974E-6 : f32
    %17 = vector.broadcast %cst_11 : f32 to vector<32x1xf32>
    %18 = arith.addf %16, %17 : vector<32x1xf32>
    %19 = math.rsqrt %18 : vector<32x1xf32>
    %cst_12 = arith.constant dense<0.000000e+00> : vector<64x1xf32>
    %20 = tpu.matmul %8, %11, %cst_12 {dimension_numbers = #tpu.dot_dimension_numbers<[1], [0], [0], [1], [0, 0, 1, 1], [], []>} : vector<64x32xf32>, vector<32x1xf32>, vector<64x1xf32> -> vector<64x1xf32>
    %cst_13 = arith.constant dense<0.000000e+00> : vector<64x1xf32>
    %21 = tpu.matmul %8, %19, %cst_13 {dimension_numbers = #tpu.dot_dimension_numbers<[1], [0], [0], [1], [0, 0, 1, 1], [], []>} : vector<64x32xf32>, vector<32x1xf32>, vector<64x1xf32> -> vector<64x1xf32>
    %c0_14 = arith.constant 0 : index
    %c0_15 = arith.constant 0 : index
    %22 = vector.load %arg4[%c0_14, %c0_15] : memref<64x1xf32, #tpu.memory_space<vmem>>, vector<64x1xf32>
    %23 = arith.mulf %22, %21 : vector<64x1xf32>
    %c0_16 = arith.constant 0 : index
    %c0_17 = arith.constant 0 : index
    %24 = vector.load %arg5[%c0_16, %c0_17] : memref<64x1xf32, #tpu.memory_space<vmem>>, vector<64x1xf32>
    %25 = arith.mulf %20, %23 : vector<64x1xf32>
    %26 = arith.subf %24, %25 : vector<64x1xf32>
    %27 = vector.broadcast %23 : vector<64x1xf32> to vector<64x256xf32>
    %28 = arith.mulf %1, %27 : vector<64x256xf32>
    %29 = vector.broadcast %26 : vector<64x1xf32> to vector<64x256xf32>
    %30 = arith.addf %28, %29 : vector<64x256xf32>
    %cst_18 = arith.constant 0.000000e+00 : f32
    %31 = vector.broadcast %cst_18 : f32 to vector<64x256xf32>
    %32 = arith.subf %31, %30 : vector<64x256xf32>
    %33 = math.exp %32 : vector<64x256xf32>
    %cst_19 = arith.constant 1.000000e+00 : f32
    %34 = vector.broadcast %cst_19 : f32 to vector<64x256xf32>
    %35 = arith.addf %34, %33 : vector<64x256xf32>
    %cst_20 = arith.constant 1.000000e+00 : f32
    %36 = vector.broadcast %cst_20 : f32 to vector<64x256xf32>
    %37 = arith.divf %36, %35 : vector<64x256xf32>
    %38 = arith.mulf %30, %37 : vector<64x256xf32>
    %cst_21 = arith.constant 0.000000e+00 : f32
    %39 = vector.broadcast %cst_21 : f32 to vector<64x290xf32>
    %c0_22 = arith.constant 0 : index
    %c0_23 = arith.constant 0 : index
    %40 = vector.load %arg10[%c0_22, %c0_23] : memref<64x290xf32, #tpu.memory_space<vmem>>, vector<64x290xf32>
    tpu.vector_store %arg10[%c0_22, %c0_23], %39 {strides = array<i32>} : memref<64x290xf32, #tpu.memory_space<vmem>>, vector<64x290xf32>,
    %c0_24 = arith.constant 0 : index
    %c17 = arith.constant 17 : index
    %41 = vector.load %arg10[%c0_24, %c17] : memref<64x290xf32, #tpu.memory_space<vmem>>, vector<64x256xf32>
    tpu.vector_store %arg10[%c0_24, %c17], %38 {strides = array<i32>} : memref<64x290xf32, #tpu.memory_space<vmem>>, vector<64x256xf32>,
    %c0_25 = arith.constant 0 : index
    %c0_26 = arith.constant 0 : index
    %42 = vector.load %arg10[%c0_25, %c0_26] : memref<64x290xf32, #tpu.memory_space<vmem>>, vector<64x256xf32>
    %c0_27 = arith.constant 0 : index
    %c0_28 = arith.constant 0 : index
    %c0_29 = arith.constant 0 : index
    %43 = vector.load %arg8[%c0_27, %c0_28, %c0_29] : memref<9x1x256xf32, #tpu.memory_space<vmem>>, vector<1x1x256xf32>
    %44 = vector.shape_cast %43 : vector<1x1x256xf32> to vector<1x256xf32>
    %45 = vector.broadcast %44 : vector<1x256xf32> to vector<64x256xf32>
    %46 = arith.mulf %42, %45 : vector<64x256xf32>
    %c0_30 = arith.constant 0 : index
    %c1 = arith.constant 1 : index
    %47 = vector.load %arg10[%c0_30, %c1] : memref<64x290xf32, #tpu.memory_space<vmem>>, vector<64x256xf32>
    %c1_31 = arith.constant 1 : index
    %c0_32 = arith.constant 0 : index
    %c0_33 = arith.constant 0 : index
    %48 = vector.load %arg8[%c1_31, %c0_32, %c0_33] : memref<9x1x256xf32, #tpu.memory_space<vmem>>, vector<1x1x256xf32>
    %49 = vector.shape_cast %48 : vector<1x1x256xf32> to vector<1x256xf32>
    %50 = vector.broadcast %49 : vector<1x256xf32> to vector<64x256xf32>
    %51 = arith.mulf %47, %50 : vector<64x256xf32>
    %c0_34 = arith.constant 0 : index
    %c2 = arith.constant 2 : index
    %52 = vector.load %arg10[%c0_34, %c2] : memref<64x290xf32, #tpu.memory_space<vmem>>, vector<64x256xf32>
    %c2_35 = arith.constant 2 : index
    %c0_36 = arith.constant 0 : index
    %c0_37 = arith.constant 0 : index
    %53 = vector.load %arg8[%c2_35, %c0_36, %c0_37] : memref<9x1x256xf32, #tpu.memory_space<vmem>>, vector<1x1x256xf32>
    %54 = vector.shape_cast %53 : vector<1x1x256xf32> to vector<1x256xf32>
    %55 = vector.broadcast %54 : vector<1x256xf32> to vector<64x256xf32>
    %56 = arith.mulf %52, %55 : vector<64x256xf32>
    %c0_38 = arith.constant 0 : index
    %c16 = arith.constant 16 : index
    %57 = vector.load %arg10[%c0_38, %c16] : memref<64x290xf32, #tpu.memory_space<vmem>>, vector<64x256xf32>
    %c3 = arith.constant 3 : index
    %c0_39 = arith.constant 0 : index
    %c0_40 = arith.constant 0 : index
    %58 = vector.load %arg8[%c3, %c0_39, %c0_40] : memref<9x1x256xf32, #tpu.memory_space<vmem>>, vector<1x1x256xf32>
    %59 = vector.shape_cast %58 : vector<1x1x256xf32> to vector<1x256xf32>
    %60 = vector.broadcast %59 : vector<1x256xf32> to vector<64x256xf32>
    %61 = arith.mulf %57, %60 : vector<64x256xf32>
    %c0_41 = arith.constant 0 : index
    %c18 = arith.constant 18 : index
    %62 = vector.load %arg10[%c0_41, %c18] : memref<64x290xf32, #tpu.memory_space<vmem>>, vector<64x256xf32>
    %c5 = arith.constant 5 : index
    %c0_42 = arith.constant 0 : index
    %c0_43 = arith.constant 0 : index
    %63 = vector.load %arg8[%c5, %c0_42, %c0_43] : memref<9x1x256xf32, #tpu.memory_space<vmem>>, vector<1x1x256xf32>
    %64 = vector.shape_cast %63 : vector<1x1x256xf32> to vector<1x256xf32>
    %65 = vector.broadcast %64 : vector<1x256xf32> to vector<64x256xf32>
    %66 = arith.mulf %62, %65 : vector<64x256xf32>
    %c0_44 = arith.constant 0 : index
    %c32 = arith.constant 32 : index
    %67 = vector.load %arg10[%c0_44, %c32] : memref<64x290xf32, #tpu.memory_space<vmem>>, vector<64x256xf32>
    %c6 = arith.constant 6 : index
    %c0_45 = arith.constant 0 : index
    %c0_46 = arith.constant 0 : index
    %68 = vector.load %arg8[%c6, %c0_45, %c0_46] : memref<9x1x256xf32, #tpu.memory_space<vmem>>, vector<1x1x256xf32>
    %69 = vector.shape_cast %68 : vector<1x1x256xf32> to vector<1x256xf32>
    %70 = vector.broadcast %69 : vector<1x256xf32> to vector<64x256xf32>
    %71 = arith.mulf %67, %70 : vector<64x256xf32>
    %c0_47 = arith.constant 0 : index
    %c33 = arith.constant 33 : index
    %72 = vector.load %arg10[%c0_47, %c33] : memref<64x290xf32, #tpu.memory_space<vmem>>, vector<64x256xf32>
    %c7 = arith.constant 7 : index
    %c0_48 = arith.constant 0 : index
    %c0_49 = arith.constant 0 : index
    %73 = vector.load %arg8[%c7, %c0_48, %c0_49] : memref<9x1x256xf32, #tpu.memory_space<vmem>>, vector<1x1x256xf32>
    %74 = vector.shape_cast %73 : vector<1x1x256xf32> to vector<1x256xf32>
    %75 = vector.broadcast %74 : vector<1x256xf32> to vector<64x256xf32>
    %76 = arith.mulf %72, %75 : vector<64x256xf32>
    %c0_50 = arith.constant 0 : index
    %c34 = arith.constant 34 : index
    %77 = vector.load %arg10[%c0_50, %c34] : memref<64x290xf32, #tpu.memory_space<vmem>>, vector<64x256xf32>
    %c8 = arith.constant 8 : index
    %c0_51 = arith.constant 0 : index
    %c0_52 = arith.constant 0 : index
    %78 = vector.load %arg8[%c8, %c0_51, %c0_52] : memref<9x1x256xf32, #tpu.memory_space<vmem>>, vector<1x1x256xf32>
    %79 = vector.shape_cast %78 : vector<1x1x256xf32> to vector<1x256xf32>
    %80 = vector.broadcast %79 : vector<1x256xf32> to vector<64x256xf32>
    %81 = arith.mulf %77, %80 : vector<64x256xf32>
    %82 = tpu.concatenate %46, %51, %56, %61, %38, %66, %71, %76, %81 in 0 : vector<64x256xf32>, vector<64x256xf32>, vector<64x256xf32>, vector<64x256xf32>, vector<64x256xf32>, vector<64x256xf32>, vector<64x256xf32>, vector<64x256xf32>, vector<64x256xf32> -> vector<576x256xf32>
    %c0_53 = arith.constant 0 : index
    %c0_54 = arith.constant 0 : index
    %83 = vector.load %arg2[%c0_53, %c0_54] : memref<4x576xf32, #tpu.memory_space<vmem>>, vector<4x576xf32>
    %cst_55 = arith.constant dense<0.000000e+00> : vector<4x256xf32>
    %84 = tpu.matmul %83, %82, %cst_55 {dimension_numbers = #tpu.dot_dimension_numbers<[1], [0], [0], [1], [0, 0, 1, 1], [], []>} : vector<4x576xf32>, vector<576x256xf32>, vector<4x256xf32> -> vector<4x256xf32>
    %c0_56 = arith.constant 0 : index
    %c0_57 = arith.constant 0 : index
    %85 = vector.load %arg3[%c0_56, %c0_57] : memref<4x1xf32, #tpu.memory_space<vmem>>, vector<4x1xf32>
    %86 = vector.broadcast %85 : vector<4x1xf32> to vector<4x256xf32>
    %87 = arith.addf %84, %86 : vector<4x256xf32>
    %c0_58 = arith.constant 0 : index
    %c0_59 = arith.constant 0 : index
    %c0_60 = arith.constant 0 : index
    %88 = vector.load %arg9[%c0_58, %c0_59, %c0_60] : memref<1x4x256xf32, #tpu.memory_space<vmem>>, vector<1x4x256xf32>
    %89 = vector.shape_cast %88 : vector<1x4x256xf32> to vector<4x256xf32>
    %90 = vector.shape_cast %87 : vector<4x256xf32> to vector<1x4x256xf32>
    tpu.vector_store %arg9[%c0_58, %c0_59, %c0_60], %90 {strides = array<i32>} : memref<1x4x256xf32, #tpu.memory_space<vmem>>, vector<1x4x256xf32>,
    return
  }
  func.func @transform_0(%arg0: i32) -> (i32, i32, i32) {
    %c0_i32 = arith.constant 0 : i32
    %c0_i32_0 = arith.constant 0 : i32
    %c0_i32_1 = arith.constant 0 : i32
    return %arg0, %c0_i32, %c0_i32_0 : i32, i32, i32
  }
  func.func @transform_1(%arg0: i32) -> (i32, i32) {
    %c0_i32 = arith.constant 0 : i32
    %c0_i32_0 = arith.constant 0 : i32
    %c0_i32_1 = arith.constant 0 : i32
    return %c0_i32, %c0_i32_0 : i32, i32
  }
  func.func @transform_2(%arg0: i32) -> (i32, i32) {
    %c0_i32 = arith.constant 0 : i32
    %c0_i32_0 = arith.constant 0 : i32
    %c0_i32_1 = arith.constant 0 : i32
    return %c0_i32, %c0_i32_0 : i32, i32
  }
  func.func @transform_3(%arg0: i32) -> (i32, i32) {
    %c0_i32 = arith.constant 0 : i32
    %c0_i32_0 = arith.constant 0 : i32
    %c0_i32_1 = arith.constant 0 : i32
    return %c0_i32, %c0_i32_0 : i32, i32
  }
  func.func @transform_4(%arg0: i32) -> (i32, i32) {
    %c0_i32 = arith.constant 0 : i32
    %c0_i32_0 = arith.constant 0 : i32
    %c0_i32_1 = arith.constant 0 : i32
    return %c0_i32, %c0_i32_0 : i32, i32
  }
  func.func @transform_5(%arg0: i32) -> (i32, i32) {
    %c0_i32 = arith.constant 0 : i32
    %c0_i32_0 = arith.constant 0 : i32
    %c0_i32_1 = arith.constant 0 : i32
    return %c0_i32, %c0_i32_0 : i32, i32
  }
  func.func @transform_6(%arg0: i32) -> (i32, i32) {
    %c0_i32 = arith.constant 0 : i32
    %c0_i32_0 = arith.constant 0 : i32
    %c0_i32_1 = arith.constant 0 : i32
    return %c0_i32, %c0_i32_0 : i32, i32
  }
  func.func @transform_7(%arg0: i32) -> (i32, i32, i32) {
    %c0_i32 = arith.constant 0 : i32
    %c0_i32_0 = arith.constant 0 : i32
    %c0_i32_1 = arith.constant 0 : i32
    %c0_i32_2 = arith.constant 0 : i32
    return %c0_i32, %c0_i32_0, %c0_i32_1 : i32, i32, i32
  }
  func.func @transform_8(%arg0: i32) -> (i32, i32, i32) {
    %c0_i32 = arith.constant 0 : i32
    %c0_i32_0 = arith.constant 0 : i32
    %c0_i32_1 = arith.constant 0 : i32
    return %arg0, %c0_i32, %c0_i32_0 : i32, i32, i32
  }
}

</mosaic_0001>

<bundles_post_ra>
// kernel: tpu_custom_call.1
= control target key start
LH: loop header
LB: loop body
LE: loop exit
PB: predicated region body
PF: predicated region fallthrough
CT: control target
= control target key end

     0   :  { %13 = vsyncpa [#allocation4], 0  ;;  %s5529_s0 = inlined_call_operand.hbm [shape: f32[2,64,256], index: 0, kind: input, shape index: {}]   ;;  %s5530_s1 = inlined_call_operand.vmem [shape: f32[4,576], index: 1, kind: input, shape index: {}]   ;;  %s5531_s2 = inlined_call_operand.vmem [shape: f32[4,1], index: 2, kind: input, shape index: {}]   ;;  %s5532_s3 = inlined_call_operand.vmem [shape: f32[64,1], index: 3, kind: input, shape index: {}]   ;;  %s5533_s4 = inlined_call_operand.vmem [shape: f32[64,1], index: 4, kind: input, shape index: {}]   ;;  %s5534_s5 = inlined_call_operand.vmem [shape: f32[32,64], index: 5, kind: input, shape index: {}]   ;;  %s5535_s6 = inlined_call_operand.vmem [shape: f32[64,32], index: 6, kind: input, shape index: {}]   ;;  %s5536_s7 = inlined_call_operand.vmem [shape: f32[9,1,256], index: 7, kind: input, shape index: {}]   ;;  %s5537_s8 = inlined_call_operand.hbm [shape: f32[2,4,256], index: 8, kind: output, shape index: {}]  }
   0x1   :  { %15 = vsyncpa [#allocation4 + $0x1], 0 }
   0x2   :  { %16 = vsyncpa [#allocation5], 0 }
   0x3   :  { %18 = vsyncpa [#allocation5 + $0x1], 0  ;;  %s3770_s27 = smov 0   ;;  %s3772_s28 = smov 0  }
   0x4   :  { %s3774_s29 = smov 0   ;;  %s3776_s30 = smov 0  }
   0x5 LB: > { %s3791_s9 = sadd.s32 4294967295, %s3702_s30   ;;  %s2667_s10 = sadd.s32 4294967294, %s3702_s30   ;;  %s3702_s30 = sphi %s3776_s30, %s5662_s30   ;;  %s3698_s29 = sphi %s3774_s29, %s5661_s29   ;;  %s3694_s28 = sphi %s3772_s28, %s5660_s28   ;;  %s3690_s27 = sphi %s3770_s27, %s5659_s27  }
   0x6   : > { %s3795_s11 = sadd.s32 1, %s3702_s30   ;;  %s31_s12 = sadd.s32 1, %s3698_s29 }
   0x7   : > { %s28_s13 = ssub.s32 %s3702_s30, %s3795_s11  ;;  %p38_p0 = scmp.ne.s32.totalorder %s3698_s29, %s3694_s28 }
   0x8   : > { %p29_p1 = scmp.eq.s32.totalorder %s28_s13, 0  ;;  %p39_p2 = scmp.eq.s32.totalorder %s3702_s30, 0 }
   0x9   : > { %p44_p3 = scmp.ne.s32.totalorder %s3694_s28, %s3690_s27  ;;  %p45_p4 = scmp.eq.s32.totalorder %s3791_s9, 0 }
   0xa   : > { %s3807_s14 = scalar_select %p29_p1, %s3698_s29, %s31_s12  }
   0xb   : > { %p3809_p5 = por %p39_p2, %p38_p0  ;;  %p3813_p6 = por %p45_p4, %p44_p3 }
   0xc   : > { %p215_p7 = scmp.eq.s32.totalorder %s3791_s9, 1  ;;  %p221_p8 = scmp.eq.s32.totalorder %s2667_s10, 1 }
   0xd   : > { %p3057_p10 = scmp.lt.s32.totalorder %s3702_s30, 2  ;;  %s262_s19 = sand.u32 1, %s3698_s29  }
   0xe   : > { %p3820_p11 = por %p215_p7, %p38_p0  ;;  %p3824_p12 = por %p221_p8, %p44_p3 }
   0xf   : > { %s2713_s20 = sshll.u32 %s3702_s30, 11  ;;  %s2670_s21 = sshll.u32 %s262_s19, 7 }
  0x10   : > { %s5567_s17 = scalar_select %p3820_p11, 1, 0 }
  0x11   : > { %s5568_s18 = scalar_select %p3824_p12, 1, 0 }
  0x12   : > { %s3833_s24 = scalar_lea.hbm %s5529_s0, %s2713_s20  ;;  %s266_s25 = scalar_lea.vmem [#allocation3], %s2670_s21 }
  0x13   : > { %s273_s26 = sshll.u32 %s266_s25, 4  ;;  %p3837_p13 = pnand %p3057_p10, %p3809_p5  ;;  %s3841_s26 = int_to_ptr.vmem [resolvable:$true] %s273_s26 }
  0x14   : > { %s3843_s12 = scalar_lea.sflag [#allocation4], %s262_s19  ;;  %s3606_s13 = scalar_lea.hbm %s3833_s24, 2048 }
  0x15   : > { %p3607_p0 = scmp.ne.s32.totalorder %s3833_s24, %s3606_s13  ;;  %p3608_p1 = pneg %p3837_p13 }
  0x16   : > { %s3611_s21 = scalar_lea.hbm %s5529_s0, 4096  ;;  %p3612_p4 = scmp.lt.u32.totalorder %s3833_s24, %s5529_s0 }
  0x17   : > { %p3609_p2 = pnand %p3608_p1, %p3607_p0  ;;  %p3613_p5 = scmp.lt.u32.totalorder %s3611_s21, %s3606_s13 }
  0x18   : > { %p3615_p8 = scmp.lt.u32.totalorder %s3606_s13, %s3833_s24 }
  0x19   : > { %p3610_p3 = pneg %p3609_p2  ;;  %p3614_p7 = por %p3613_p5, %p3612_p4 }
  0x1b   : > { %p3616_p10 = por %p3615_p8, %p3614_p7 }
  0x1d   : > { %p3617_p9 = pnand %p3616_p10, %p3610_p3 }
  0x1f   : > { %3620 = shalt.err (!%p3617_p9)
}
  0x20   : > { %s3621_s19 = scalar_lea.vmem %s3841_s26, 2048  ;;  %s3704_s25 = smov [#allocation3]  }
  0x21   : > { %p3622_p0 = scmp.ne.s32.totalorder %s3841_s26, %s3621_s19  ;;  %s3626_s20 = sshll.u32 %s3704_s25, 4  ;;  %s3627_s20 = int_to_ptr.vmem [resolvable:$false] %s3626_s20 }
  0x22   : > { %s3628_s15 = scalar_lea.vmem %s3627_s20, 4096  ;;  %p3629_p11 = scmp.lt.s32.totalorder %s3841_s26, %s3627_s20 }
  0x23   : > { %p3624_p2 = pnand %p3622_p0, %p3608_p1  ;;  %p3630_p4 = scmp.lt.s32.totalorder %s3628_s15, %s3621_s19 }
  0x25   : > { %p3625_p12 = pneg %p3624_p2  ;;  %p3631_p5 = por %p3630_p4, %p3629_p11 }
  0x27   : > { %p3632_p7 = pnand %p3631_p5, %p3625_p12 }
  0x29   : > { %3635 = shalt.err (!%p3632_p7)
}
  0x2a   : > { %s3705_s13 = smov 256   ;;  %s3706_s21 = smov 16  }
  0x2b   : > { %3052 = dma.hbm_to_vmem [thread:$0]  (!%p3837_p13), %s3833_s24, 2048, %s3841_s26, %s3843_s12, %s3705_s13, %s3705_s13, %s3706_s21  }
  0x2c   : > { %p2673_p9 = scmp.ge.s32.totalorder %s3702_s30, 1  ;;  %p281_p1 = scmp.lt.s32.totalorder %s3702_s30, 3 }
  0x2e   : > { %p282_p3 = pnand %p2673_p9, %p281_p1 }
  0x30   : > { %285 = sbr.rel (%p282_p3) target bundleno = 1511 (0x5e7), region = 52 }
  0x37   : > { %s3874_s22 = sand.u32 1, %s3694_s28  }
  0x38   : > { %s2674_s23 = sshll.u32 %s3874_s22, 7  ;;  %s288_s19 = scalar_lea.sflag [#allocation4], %s3874_s22 }
  0x39   : > { %s3878_s25 = scalar_lea.vmem [#allocation3], %s2674_s23 }
  0x3a   : > { %3681 = dma.done.wait (%p3813_p6), %s288_s19, 2048  }
  0x3b   : > { %3683 = vsyncadd (%p3813_p6), %s288_s19, 4294965248  ;;  %v3885_v0 = vld [vmem:[%s3878_s25 + $0x30] sm:$0xff]  ;;  %v3888_v1 = vld [vmem:[%s3878_s25 + $0x38] sm:$0xff]  ;;  %vm416_vm0 = vcmask 523264   ;;  %vm623_vm1 = vcmask 261120   ;;  %s3707_s26 = smov 18  }
  0x3c   : > { %v3891_v2 = vld [vmem:[%s3878_s25] sm:$0xff]  ;;  %v349_v3 = vadd.f32 %v3888_v1, %v3885_v0  ;;  %v3896_v4 = vld [vmem:[%s3878_s25 + $0x8] sm:$0xff]  ;;  %v3901_v6 = vld [vmem:[%s3878_s25 + $0x10] sm:$0xff]  ;;  %v370_v17 = vmul.f32 %v3885_v0, %v3885_v0  ;;  %v371_v18 = vmul.f32 %v3888_v1, %v3888_v1  ;;  %s3708_s20 = smov 1   ;;  %s3709_s15 = smov 32   ;;  %vm1124_vm2 = vcmask 277504  }
  0x3d   : > { %v364_v5 = vmul.f32 %v3891_v2, %v3891_v2  ;;  %v3904_v7 = vld [vmem:[%s3878_s25 + $0x18] sm:$0xff]  ;;  %v340_v8 = vadd.f32 %v3896_v4, %v3891_v2  ;;  %v365_v9 = vmul.f32 %v3896_v4, %v3896_v4  ;;  %v366_v10 = vmul.f32 %v3901_v6, %v3901_v6  ;;  %v3917_v14 = vld [vmem:[%s3878_s25 + $0x20] sm:$0xff]  ;;  %v3920_v15 = vld [vmem:[%s3878_s25 + $0x28] sm:$0xff]  ;;  %s3711_s10 = smov 2   ;;  %s3712_s21 = smov 33  }
  0x3e   : > { %350 = vadd.xlane.f32.xlu1 %v349_v3  ;;  %v367_v11 = vmul.f32 %v3904_v7, %v3904_v7  ;;  %v343_v13 = vadd.f32 %v3904_v7, %v3901_v6  ;;  %v346_v19 = vadd.f32 %v3920_v15, %v3917_v14  ;;  %v368_v20 = vmul.f32 %v3917_v14, %v3917_v14  ;;  %v3933_v24 = vld [vmem:[%s3878_s25 + $0x50] sm:$0xff]  ;;  %v3936_v25 = vld [vmem:[%s3878_s25 + $0x58] sm:$0xff]  ;;  %v3939_v26 = vld [vmem:[%s3878_s25 + $0x40] sm:$0xff]  ;;  %s3713_s24 = smov 16   ;;  %s3718_s23 = smov 127  }
  0x3f   : > { %341 = vadd.xlane.f32.xlu0 %v340_v8  ;;  %v380_v12 = vadd.f32 %v365_v9, %v364_v5  ;;  %v369_v21 = vmul.f32 %v3920_v15, %v3920_v15  ;;  %v389_v22 = vadd.f32 %v371_v18, %v370_v17  ;;  %v3942_v27 = vld [vmem:[%s3878_s25 + $0x48] sm:$0xff]  ;;  %v355_v28 = vadd.f32 %v3936_v25, %v3933_v24  ;;  %v3957_v36 = vld [vmem:[%s3878_s25 + $0x70] sm:$0xff]  ;;  %v3960_v37 = vld [vmem:[%s3878_s25 + $0x78] sm:$0xff]  ;;  %s3719_s19 = smov 96   ;;  %s3721_s16 = smov 95  }
  0x40   : > { %v383_v16 = vadd.f32 %v367_v11, %v366_v10  ;;  %v374_v29 = vmul.f32 %v3933_v24, %v3933_v24  ;;  %v375_v30 = vmul.f32 %v3936_v25, %v3936_v25  ;;  %v352_v31 = vadd.f32 %v3942_v27, %v3939_v26  ;;  %v3963_v38 = vld [vmem:[%s3878_s25 + $0x60] sm:$0xff]  ;;  %v3966_v39 = vld [vmem:[%s3878_s25 + $0x68] sm:$0xff]  ;;  %v406_v18 = vld [vmem:[%s5534_s5 + $0x10] sm:$0xff]  ;;  %s3720_s25 = smov 126   ;;  %p5656_p11 = scmp.ne.s32.totalorder %s5567_s17, 0 }
  0x41   : > { %v386_v23 = vadd.f32 %v369_v21, %v368_v20  ;;  %v372_v32 = vmul.f32 %v3939_v26, %v3939_v26  ;;  %v373_v33 = vmul.f32 %v3942_v27, %v3942_v27  ;;  %v361_v40 = vadd.f32 %v3960_v37, %v3957_v36  ;;  %v404_v48 = vld [vmem:[%s5534_s5] sm:$0xff] }
  0x42   : > { %381 = vadd.xlane.f32.xlu1 %v380_v12  ;;  %v395_v34 = vadd.f32 %v375_v30, %v374_v29  ;;  %v378_v41 = vmul.f32 %v3957_v36, %v3957_v36  ;;  %v379_v42 = vmul.f32 %v3960_v37, %v3960_v37  ;;  %v358_v43 = vadd.f32 %v3966_v39, %v3963_v38  ;;  %v408_v20 = vld [vmem:[%s5535_s6] sm:$0xff] }
  0x43   : > { %344 = vadd.xlane.f32.xlu0 %v343_v13  ;;  %v392_v35 = vadd.f32 %v373_v33, %v372_v32  ;;  %v376_v44 = vmul.f32 %v3963_v38, %v3963_v38  ;;  %v377_v45 = vmul.f32 %v3966_v39, %v3966_v39  ;;  %2779 = vmatprep.mubr.msk.f32.mxu0 %vm416_vm0, %v404_v48  ;;  %v1271_v21 = vlaneseq  ;;  %v2700_v30 = vld [vmem:[%s5536_s7 + $0x2] sm:$0x3] }
  0x44   : > { %v401_v46 = vadd.f32 %v379_v42, %v378_v41  ;;  %2801 = vmatprep.mubr.msk.f32.mxu1 %vm416_vm0, %v404_v48  ;;  %vm1228_vm3 = vcmask 1047688   ;;  %vm1195_vm4 = vcmask 138240   ;;  %vm1452_vm5 = vcmask 146432  }
  0x45   : > { %v398_v47 = vadd.f32 %v377_v45, %v376_v44  ;;  %vm1320_vm6 = vcmask 7168   ;;  %vm1364_vm7 = vcmask 15360   ;;  %vm1408_vm8 = vcmask 130048  }
  0x46   : > { %384 = vadd.xlane.f32.xlu1 %v383_v16  ;;  %v405_v16 = vld [vmem:[%s5534_s5 + $0x8] sm:$0xff]  ;;  %vm1539_vm9 = vcmask 269312   ;;  %vm2103_vm10 = vcmask 785408   ;;  %vm1788_vm11 = vcmask 1031168   ;;  %vm1998_vm12 = vcmask 900096  }
  0x47   : > { %347 = vadd.xlane.f32.xlu0 %v346_v19  ;;  %v407_v19 = vld [vmem:[%s5534_s5 + $0x18] sm:$0xff]  ;;  %vm2208_vm13 = vcmask 777216   ;;  %vm1893_vm14 = vcmask 916480   ;;  %vm1683_vm15 = vcmask 1039360  }
  0x4a   : > { %390 = vadd.xlane.f32.xlu1 %v389_v22  ;;  %v1272_v22 = vshrl.u32 %v1271_v21, 7  ;;  %v413_v21 = vld [vmem:[%s5535_s6 + $0x28] sm:$0xff] }
  0x4b   : > { %387 = vadd.xlane.f32.xlu0 %v386_v23  ;;  %v2703_v23 = vld [vmem:[%s5536_s7 + $0xa] sm:$0x3] }
  0x4c   : > { %v4010_v29 = vsub.s32 1, %v1272_v22 }
  0x4e   : > { %356 = vadd.xlane.f32.xlu1 %v355_v28  ;;  %v4008_v28 = vsub.s32 0, %v1272_v22  ;;  %v1447_v32 = vrot.slane %v2703_v23, %v4010_v29 }
  0x4f   : > { %353 = vadd.xlane.f32.xlu0 %v352_v31 }
  0x50   : > { %v1443_v31 = vrot.slane %v2703_v23, %v4008_v28  ;;  %v1311_v33 = vrot.slane %v2700_v30, %v4008_v28  ;;  %v414_v23 = vld [vmem:[%s5535_s6 + $0x30] sm:$0xff] }
  0x52   : > { %396 = vadd.xlane.f32.xlu1 %v395_v34  ;;  %v1315_v34 = vrot.slane %v2700_v30, %v4010_v29 }
  0x53   : > { %393 = vadd.xlane.f32.xlu0 %v392_v35  ;;  %v2704_v35 = vld [vmem:[%s5536_s7 + $0xc] sm:$0x3] }
  0x54   : > { %v1491_v41 = vrot.slane %v2704_v35, %v4010_v29 }
  0x56   : > { %362 = vadd.xlane.f32.xlu1 %v361_v40  ;;  %v1487_v40 = vrot.slane %v2704_v35, %v4008_v28  ;;  %v3710_v35 = vmov 0  }
  0x57   : > { %359 = vadd.xlane.f32.xlu0 %v358_v43  ;;  %3110 = vset.pattern.permute.xlu1 %v3710_v35 }
  0x58   : > { %3111 = vset.pattern.permute.xlu0 %v3710_v35  ;;  %v881_v35 = vld [vmem:[%s5533_s4 + $0x38] sm:$0xff] }
  0x5a   : > { %402 = vadd.xlane.f32.xlu1 %v401_v46 }
  0x5b   : > { %399 = vadd.xlane.f32.xlu0 %v398_v47 }
  0x6b   : > { %1448 = vrot.lane.b32.xlu1 %v1443_v31, %s3707_s26 }
  0x6f   : > { %1316 = vrot.lane.b32.xlu1 %v1311_v33, %s3708_s20 }
  0x71   : > { %1450 = vrot.lane.b32.xlu0 %v1447_v32, %s3707_s26  ;;  %v415_v32 = vld [vmem:[%s5535_s6 + $0x38] sm:$0xff]  ;;  %s3723_s26 = smov 94  }
  0x73   : > { %1492 = vrot.lane.b32.xlu1 %v1487_v40, %s3709_s15 }
  0x75   : > { %1318 = vrot.lane.b32.xlu0 %v1315_v34, %s3708_s20  ;;  %s3714_s20 = smov 34  }
  0x79   : > { %1494 = vrot.lane.b32.xlu0 %v1491_v41, %s3709_s15  ;;  %s2583_s15 = scalar_lea.sflag [#allocation5], %s3874_s22 }
  0xcb   : > { %v351_v49 = vpop.xlane.xlu1 %350 }
  0xcc   : > { %v342_v50 = vpop.xlane.xlu0 %341 }
  0xcf   : > { %v382_v51 = vpop.xlane.xlu1 %381 }
  0xd0   : > { %v345_v52 = vpop.xlane.xlu0 %344 }
  0xd1   : > { %v2847_v53 = vpack.c.bf16 %v345_v52, %v342_v50 }
  0xd3   : > { %2848 = vmatprep.subr.bf16.mxu0 %v2847_v53  ;;  %v385_v54 = vpop.xlane.xlu1 %384 }
  0xd4   : > { %2850 = vmatpush3.bf16.msra.mxu0 %v2847_v53  ;;  %v348_v55 = vpop.xlane.xlu0 %347  ;;  %v2863_v56 = vpack.c.bf16 %v385_v54, %v382_v51 }
  0xd5   : > { %v2851_v57 = vpack.c.bf16 %v351_v49, %v348_v55 }
  0xd6   : > { %2864 = vmatprep.subr.bf16.mxu1 %v2863_v56 }
  0xd7   : > { %2852 = vmatprep.subr.bf16.mxu0 %v2851_v57  ;;  %2866 = vmatpush3.bf16.msra.mxu1 %v2863_v56  ;;  %v391_v58 = vpop.xlane.xlu1 %390 }
  0xd8   : > { %2854 = vmatpush3.bf16.msra.mxu0 %v2851_v57  ;;  %v388_v59 = vpop.xlane.xlu0 %387 }
  0xd9   : > { %v2867_v60 = vpack.c.bf16 %v391_v58, %v388_v59 }
  0xdb   : > { %2868 = vmatprep.subr.bf16.mxu1 %v2867_v60  ;;  %v357_v61 = vpop.xlane.xlu1 %356 }
  0xdc   : > { %2870 = vmatpush3.bf16.msra.mxu1 %v2867_v60  ;;  %v354_v62 = vpop.xlane.xlu0 %353 }
  0xdd   : > { %v2855_v63 = vpack.c.bf16 %v357_v61, %v354_v62 }
  0xdf   : > { %2856 = vmatprep.subr.bf16.mxu0 %v2855_v63  ;;  %v397_v3 = vpop.xlane.xlu1 %396 }
  0xe0   : > { %2858 = vmatpush3.bf16.msra.mxu0 %v2855_v63  ;;  %v394_v5 = vpop.xlane.xlu0 %393 }
  0xe1   : > { %v2871_v8 = vpack.c.bf16 %v397_v3, %v394_v5 }
  0xe3   : > { %2872 = vmatprep.subr.bf16.mxu1 %v2871_v8  ;;  %v363_v9 = vpop.xlane.xlu1 %362 }
  0xe4   : > { %2874 = vmatpush3.bf16.msra.mxu1 %v2871_v8  ;;  %v360_v10 = vpop.xlane.xlu0 %359 }
  0xe5   : > { %v2859_v11 = vpack.c.bf16 %v363_v9, %v360_v10 }
  0xe7   : > { %2860 = vmatprep.subr.bf16.mxu0 %v2859_v11  ;;  %v403_v12 = vpop.xlane.xlu1 %402 }
  0xe8   : > { %2862 = vmatpush3.bf16.msra.mxu0 %v2859_v11  ;;  %v400_v13 = vpop.xlane.xlu0 %399  ;;  %v409_v11 = vld [vmem:[%s5535_s6 + $0x8] sm:$0xff] }
  0xe9   : > { %v2875_v17 = vpack.c.bf16 %v403_v12, %v400_v13 }
  0xeb   : > { %2780 = vmatmul.mubr.msk.f32.vlgmr.msra.gmra.mrb[0].mxu0 %vm416_vm0, %v405_v16  ;;  %2876 = vmatprep.subr.bf16.mxu1 %v2875_v17 }
  0xec   : > { %2878 = vmatpush3.bf16.msra.mxu1 %v2875_v17  ;;  %2782 = vmatprep.mubr.msk.f32.mxu0 %vm416_vm0, %v406_v18  ;;  %v410_v17 = vld [vmem:[%s5535_s6 + $0x10] sm:$0xff] }
  0xef   : > { %2783 = vmatmul.mubr.msk.f32.gmra.mrb[2].mxu0 %vm416_vm0, %v407_v19  ;;  %2802 = vmatmul.mubr.msk.f32.vlgmr.msra.gmra.mrb[0].mxu1 %vm416_vm0, %v405_v16 }
  0xf0   : > { %2804 = vmatprep.mubr.msk.f32.mxu1 %vm416_vm0, %v406_v18  ;;  %2815 = vmatprep.mubr.msk.f32.mxu0 %vm623_vm1, %v408_v20  ;;  %v411_v18 = vld [vmem:[%s5535_s6 + $0x18] sm:$0xff] }
  0xf3   : > { %2805 = vmatmul.mubr.msk.f32.gmra.mrb[2].mxu1 %vm416_vm0, %v407_v19  ;;  %v412_v19 = vld [vmem:[%s5535_s6 + $0x20] sm:$0xff] }
  0xf4   : > { %2835 = vmatprep.mubr.msk.f32.mxu1 %vm623_vm1, %v408_v20 }
 0x1be   : > { %v2781_v42 = vpop.f32.mrb[0].mxu0 }
 0x1bf   : > { %v515_v43 = vmul.f32 0.001953125, %v2781_v42  ;;  %v495_v44 = vpop.f32.mrb[1].mxu0 }
 0x1c0   : > { %v514_v45 = vmul.f32 0.001953125, %v495_v44 }
 0x1c1   : > { %v608_v46 = vmul.f32 %v515_v43, %v515_v43 }
 0x1c2   : > { %v607_v47 = vmul.f32 %v514_v45, %v514_v45  ;;  %v2879_v48 = vpack.c.bf16 %v515_v43, %v514_v45  ;;  %v2784_v49 = vpop.f32.mrb[2].mxu0  ;;  %v2803_v50 = vpop.f32.mrb[0].mxu1 }
 0x1c3   : > { %v517_v51 = vmul.f32 0.001953125, %v2784_v49  ;;  %v604_v52 = vmul.f32 0.001953125, %v2803_v50  ;;  %v505_v53 = vpop.f32.mrb[3].mxu0  ;;  %v584_v54 = vpop.f32.mrb[1].mxu1  ;;  %v858_v49 = vld [vmem:[%s5532_s3] sm:$0xff] }
 0x1c4   : > { %v516_v55 = vmul.f32 0.001953125, %v505_v53  ;;  %v603_v56 = vmul.f32 0.001953125, %v584_v54  ;;  %2880 = vmatprep.subr.bf16.mxu0 %v2879_v48  ;;  %v875_v54 = vld [vmem:[%s5533_s4 + $0x8] sm:$0xff] }
 0x1c5   : > { %v610_v57 = vmul.f32 %v517_v51, %v517_v51  ;;  %v612_v58 = vsub.f32 %v604_v52, %v608_v46  ;;  %2882 = vmatpush3.bf16.msra.mxu0 %v2879_v48  ;;  %v859_v48 = vld [vmem:[%s5532_s3 + $0x8] sm:$0xff] }
 0x1c6   : > { %v609_v59 = vmul.f32 %v516_v55, %v516_v55  ;;  %v2883_v60 = vpack.c.bf16 %v517_v51, %v516_v55  ;;  %v611_v61 = vsub.f32 %v603_v56, %v607_v47  ;;  %v2806_v62 = vpop.f32.mrb[2].mxu1  ;;  %v861_v55 = vld [vmem:[%s5532_s3 + $0x18] sm:$0xff] }
 0x1c7   : > { %v616_v63 = vadd.f32 1e-05, %v612_v58  ;;  %v606_v3 = vmul.f32 0.001953125, %v2806_v62  ;;  %v594_v5 = vpop.f32.mrb[3].mxu1 }
 0x1c8   : > { %v615_v8 = vadd.f32 1e-05, %v611_v61  ;;  %v605_v9 = vmul.f32 0.001953125, %v594_v5  ;;  %2884 = vmatprep.subr.bf16.mxu0 %v2883_v60 }
 0x1c9   : > { %3534 = vrsqrt.f32 %v616_v63  ;;  %v614_v10 = vsub.f32 %v606_v3, %v610_v57  ;;  %2886 = vmatpush3.bf16.msra.mxu0 %v2883_v60  ;;  %v860_v57 = vld [vmem:[%s5532_s3 + $0x10] sm:$0xff]  ;;  %v863_v3 = vld [vmem:[%s5532_s3 + $0x28] sm:$0xff] }
 0x1ca   : > { %3536 = vrsqrt.f32 %v615_v8  ;;  %v613_v12 = vsub.f32 %v605_v9, %v609_v59  ;;  %v862_v8 = vld [vmem:[%s5532_s3 + $0x20] sm:$0xff] }
 0x1cb   : > { %v618_v13 = vadd.f32 1e-05, %v614_v10 }
 0x1cc   : > { %v617_v16 = vadd.f32 1e-05, %v613_v12  ;;  %2816 = vmatmul.mubr.msk.f32.vlgmr.msra.gmra.mrb[4].mxu0 %vm623_vm1, %v409_v11 }
 0x1cd   : > { %3538 = vrsqrt.f32 %v618_v13  ;;  %2818 = vmatprep.mubr.msk.f32.mxu0 %vm623_vm1, %v410_v17  ;;  %v874_v13 = vld [vmem:[%s5533_s4] sm:$0xff] }
 0x1ce   : > { %3540 = vrsqrt.f32 %v617_v16  ;;  %v879_v16 = vld [vmem:[%s5533_s4 + $0x28] sm:$0xff] }
 0x1d0   : > { %2819 = vmatmul.mubr.msk.f32.gmra.mrb[6].mxu0 %vm623_vm1, %v411_v18 }
 0x1d1   : > { %2821 = vmatprep.mubr.msk.f32.mxu0 %vm623_vm1, %v412_v19 }
 0x1d3   : > { %v3535_v20 = vpop.eup %3534 }
 0x1d4   : > { %v3537_v22 = vpop.eup %3536  ;;  %2822 = vmatmul.mubr.msk.f32.gmra.mrb[8].mxu0 %vm623_vm1, %v413_v21 }
 0x1d5   : > { %v2887_v30 = vpack.c.bf16 %v3535_v20, %v3537_v22  ;;  %2824 = vmatprep.mubr.msk.f32.mxu0 %vm623_vm1, %v414_v23  ;;  %v864_v20 = vld [vmem:[%s5532_s3 + $0x30] sm:$0xff] }
 0x1d7   : > { %v3539_v31 = vpop.eup %3538  ;;  %2888 = vmatprep.subr.bf16.mxu1 %v2887_v30 }
 0x1d8   : > { %v3541_v33 = vpop.eup %3540  ;;  %2890 = vmatpush3.bf16.msra.mxu1 %v2887_v30  ;;  %2825 = vmatmul.mubr.msk.f32.gmra.mrb[10].mxu0 %vm623_vm1, %v415_v32 }
 0x1d9   : > { %v2891_v34 = vpack.c.bf16 %v3539_v31, %v3541_v33 }
 0x1db   : > { %2892 = vmatprep.subr.bf16.mxu1 %v2891_v34 }
 0x1dc   : > { %2894 = vmatpush3.bf16.msra.mxu1 %v2891_v34 }
 0x1df   : > { %2836 = vmatmul.mubr.msk.f32.vlgmr.msra.gmra.mrb[4].mxu1 %vm623_vm1, %v409_v11 }
 0x1e0   : > { %2838 = vmatprep.mubr.msk.f32.mxu1 %vm623_vm1, %v410_v17 }
 0x1e3   : > { %2839 = vmatmul.mubr.msk.f32.gmra.mrb[6].mxu1 %vm623_vm1, %v411_v18  ;;  %v865_v18 = vld [vmem:[%s5532_s3 + $0x38] sm:$0xff] }
 0x1e4   : > { %2841 = vmatprep.mubr.msk.f32.mxu1 %vm623_vm1, %v412_v19 }
 0x1e7   : > { %2842 = vmatmul.mubr.msk.f32.gmra.mrb[8].mxu1 %vm623_vm1, %v413_v21 }
 0x1e8   : > { %2844 = vmatprep.mubr.msk.f32.mxu1 %vm623_vm1, %v414_v23 }
 0x1eb   : > { %2845 = vmatmul.mubr.msk.f32.gmra.mrb[10].mxu1 %vm623_vm1, %v415_v32 }
 0x29f   : > { %v2817_v40 = vpop.f32.mrb[4].mxu0 }
 0x2a0   : > { %v714_v41 = vpop.f32.mrb[5].mxu0 }
 0x2a3   : > { %v2820_v42 = vpop.f32.mrb[6].mxu0 }
 0x2a4   : > { %v724_v43 = vpop.f32.mrb[7].mxu0 }
 0x2a7   : > { %v2823_v44 = vpop.f32.mrb[8].mxu0 }
 0x2a8   : > { %v734_v45 = vpop.f32.mrb[9].mxu0 }
 0x2ab   : > { %v2826_v46 = vpop.f32.mrb[10].mxu0 }
 0x2ac   : > { %v744_v47 = vpop.f32.mrb[11].mxu0 }
 0x2b2   : > { %v2837_v50 = vpop.f32.mrb[4].mxu1 }
 0x2b3   : > { %v867_v51 = vmul.f32 %v2837_v50, %v859_v48  ;;  %v819_v52 = vpop.f32.mrb[5].mxu1  ;;  %v878_v48 = vld [vmem:[%s5533_s4 + $0x20] sm:$0xff] }
 0x2b4   : > { %v866_v53 = vmul.f32 %v858_v49, %v819_v52  ;;  %v2705_v49 = vld [vmem:[%s5536_s7 + $0xe] sm:$0x3]  ;;  %v2702_v52 = vld [vmem:[%s5536_s7 + $0x6] sm:$0x3] }
 0x2b5   : > { %v883_v56 = vmul.f32 %v2817_v40, %v867_v51  ;;  %905 = vperm.xlu1 %3110, %v867_v51   ;;  %v1534_v51 = vrot.slane %v2705_v49, %v4010_v29 }
 0x2b6   : > { %v882_v58 = vmul.f32 %v866_v53, %v714_v41  ;;  %900 = vperm.xlu0 %3111, %v866_v53   ;;  %v2840_v59 = vpop.f32.mrb[6].mxu1  ;;  %v877_v41 = vld [vmem:[%s5533_s4 + $0x18] sm:$0xff]  ;;  %v1403_v53 = vrot.slane %v2702_v52, %v4010_v29 }
 0x2b7   : > { %v891_v60 = vsub.f32 %v875_v54, %v883_v56  ;;  %v869_v61 = vmul.f32 %v2840_v59, %v861_v55  ;;  %v829_v62 = vpop.f32.mrb[7].mxu1  ;;  %v880_v54 = vld [vmem:[%s5533_s4 + $0x30] sm:$0xff]  ;;  %v1530_v59 = vrot.slane %v2705_v49, %v4008_v28 }
 0x2b8   : > { %v868_v63 = vmul.f32 %v860_v57, %v829_v62  ;;  %v890_v23 = vsub.f32 %v874_v13, %v882_v58  ;;  %v2706_v55 = vld [vmem:[%s5536_s7 + $0x10] sm:$0x3]  ;;  %v5539_v62 = vmov 0.0  }
 0x2b9   : > { %961 = vperm.xlu1 %3110, %v891_v60   ;;  %v885_v5 = vmul.f32 %v2820_v42, %v869_v61  ;;  %v1578_v57 = vrot.slane %v2706_v55, %v4010_v29  ;;  %v1399_v60 = vrot.slane %v2702_v52, %v4008_v28  ;;  %1126 = vst [vmem:[#allocation2 + $0x18] sm:$0xff] %v5539_v62  ;;  %1122 = vst [vmem:[#allocation2] sm:$0xff] %v5539_v62 }
 0x2ba   : > { %v2843_v9 = vpop.f32.mrb[8].mxu1  ;;  %v884_v10 = vmul.f32 %v868_v63, %v724_v43  ;;  %1129 = vst [vmem:[#allocation2 + $0x30] sm:$0xff] %v5539_v62  ;;  %1132 = vst [vmem:[#allocation2 + $0x48] sm:$0xff] %v5539_v62 }
 0x2bb   : > { %v871_v11 = vmul.f32 %v2843_v9, %v863_v3  ;;  %v839_v12 = vpop.f32.mrb[9].mxu1  ;;  %v893_v43 = vsub.f32 %v877_v41, %v885_v5  ;;  %1135 = vst [vmem:[#allocation2 + $0x60] sm:$0xff] %v5539_v62  ;;  %1138 = vst [vmem:[#allocation2 + $0x78] sm:$0xff] %v5539_v62  ;;  %v4137_v3 = vpop.permute.xlu0 %1450 }
 0x2bc   : > { %v870_v17 = vmul.f32 %v862_v8, %v839_v12  ;;  %1141 = vst [vmem:[#allocation2 + $0x90] sm:$0xff] %v5539_v62  ;;  %1144 = vst [vmem:[#allocation2 + $0xa8] sm:$0xff] %v5539_v62 }
 0x2bd   : > { %v887_v19 = vmul.f32 %v2823_v44, %v871_v11  ;;  %915 = vperm.xlu1 %3110, %v869_v61   ;;  %925 = vperm.xlu0 %3111, %v871_v11   ;;  %v876_v44 = vld [vmem:[%s5533_s4 + $0x10] sm:$0xff]  ;;  %v1574_v61 = vrot.slane %v2706_v55, %v4008_v28  ;;  %1128 = vst.msk [vmem:[#allocation2 + $0x28] sm:$0xff] %vm1124_vm2, %v5539_v62  ;;  %1125 = vst.msk [vmem:[#allocation2 + $0x10] sm:$0xff] %vm1124_vm2, %v5539_v62 }
 0x2be   : > { %v2846_v21 = vpop.f32.mrb[10].mxu1  ;;  %v886_v22 = vmul.f32 %v870_v17, %v734_v45  ;;  %v2701_v45 = vld [vmem:[%s5536_s7 + $0x4] sm:$0x3]  ;;  %1131 = vst.msk [vmem:[#allocation2 + $0x40] sm:$0xff] %vm1124_vm2, %v5539_v62  ;;  %1134 = vst.msk [vmem:[#allocation2 + $0x58] sm:$0xff] %vm1124_vm2, %v5539_v62 }
 0x2bf   : > { %v895_v30 = vsub.f32 %v879_v16, %v887_v19  ;;  %v873_v31 = vmul.f32 %v2846_v21, %v865_v18  ;;  %v849_v32 = vpop.f32.mrb[11].mxu1  ;;  %v1355_v58 = vrot.slane %v2701_v45, %v4008_v28  ;;  %v4141_v8 = vpop.permute.xlu0 %1318  ;;  %1137 = vst.msk [vmem:[#allocation2 + $0x70] sm:$0xff] %vm1124_vm2, %v5539_v62  ;;  %1140 = vst.msk [vmem:[#allocation2 + $0x88] sm:$0xff] %vm1124_vm2, %v5539_v62 }
 0x2c0   : > { %v872_v33 = vmul.f32 %v864_v20, %v849_v32  ;;  %v894_v50 = vsub.f32 %v878_v48, %v886_v22  ;;  %1143 = vst.msk [vmem:[#allocation2 + $0xa0] sm:$0xff] %vm1124_vm2, %v5539_v62  ;;  %1146 = vst.msk [vmem:[#allocation2 + $0xb8] sm:$0xff] %vm1124_vm2, %v5539_v62 }
 0x2c1   : > { %956 = vperm.xlu1 %3110, %v890_v23   ;;  %981 = vperm.xlu0 %3111, %v895_v30   ;;  %v889_v34 = vmul.f32 %v2826_v46, %v873_v31  ;;  %v1359_v46 = vrot.slane %v2701_v45, %v4010_v29 }
 0x2c2   : > { %v888_v40 = vmul.f32 %v872_v33, %v744_v47  ;;  %v892_v47 = vsub.f32 %v876_v44, %v884_v10 }
 0x2c3   : > { %v897_v42 = vsub.f32 %v881_v35, %v889_v34  ;;  %v4145_v10 = vpop.permute.xlu0 %1494 }
 0x2c4   : > { %v896_v56 = vsub.f32 %v880_v54, %v888_v40 }
 0x2c5   : > { %910 = vperm.xlu1 %3110, %v868_v63   ;;  %935 = vperm.xlu0 %3111, %v873_v31   ;;  %v4135_v63 = vpop.permute.xlu1 %1448 }
 0x2c9   : > { %971 = vperm.xlu1 %3110, %v893_v43   ;;  %991 = vperm.xlu0 %3111, %v897_v42   ;;  %v4139_v5 = vpop.permute.xlu1 %1316 }
 0x2cd   : > { %966 = vperm.xlu1 %3110, %v892_v47   ;;  %1362 = vrot.lane.b32.xlu0 %v1359_v46, %s3711_s10  ;;  %v4143_v9 = vpop.permute.xlu1 %1492 }
 0x2d1   : > { %920 = vperm.xlu1 %3110, %v870_v17   ;;  %1537 = vrot.lane.b32.xlu0 %v1534_v51, %s3712_s21 }
 0x2d5   : > { %976 = vperm.xlu1 %3110, %v894_v50   ;;  %1406 = vrot.lane.b32.xlu0 %v1403_v53, %s3713_s24 }
 0x2d9   : > { %930 = vperm.xlu1 %3110, %v872_v33   ;;  %1581 = vrot.lane.b32.xlu0 %v1578_v57, %s3714_s20 }
 0x2dd   : > { %986 = vperm.xlu1 %3110, %v896_v56  }
 0x2e1   : > { %1360 = vrot.lane.b32.xlu1 %v1355_v58, %s3711_s10  ;;  %s3716_s10 = smov 17  }
 0x2e5   : > { %1535 = vrot.lane.b32.xlu1 %v1530_v59, %s3712_s21  ;;  %s3717_s21 = smov 110  }
 0x2e9   : > { %1404 = vrot.lane.b32.xlu1 %v1399_v60, %s3713_s24  ;;  %s3722_s24 = smov 112  }
 0x2ed   : > { %1579 = vrot.lane.b32.xlu1 %v1574_v61, %s3714_s20 }
 0x334   : > { %v906_v11 = vpop.permute.xlu1 %905 }
 0x335   : > { %v940_v12 = vmul.f32 %v906_v11, %v3901_v6  ;;  %v941_v13 = vmul.f32 %v906_v11, %v3904_v7  ;;  %v901_v16 = vpop.permute.xlu0 %900 }
 0x336   : > { %v938_v32 = vmul.f32 %v901_v16, %v3891_v2  ;;  %v939_v6 = vmul.f32 %v901_v16, %v3896_v4 }
 0x338   : > { %v962_v17 = vpop.permute.xlu1 %961 }
 0x339   : > { %v4149_v18 = vadd.f32 %v962_v17, %v940_v12  ;;  %v4151_v19 = vadd.f32 %v962_v17, %v941_v13 }
 0x33b   : > { %v1012_v20 = vsub.f32 0.0, %v4149_v18  ;;  %v1013_v21 = vsub.f32 0.0, %v4151_v19 }
 0x33c   : > { %v916_v22 = vpop.permute.xlu1 %915  ;;  %v926_v23 = vpop.permute.xlu0 %925 }
 0x33d   : > { %v1030_v30 = vmul.f32 1.442695, %v1012_v20  ;;  %v1032_v31 = vmul.f32 1.442695, %v1013_v21  ;;  %v948_v34 = vmul.f32 %v926_v23, %v3933_v24  ;;  %v949_v46 = vmul.f32 %v926_v23, %v3936_v25 }
 0x33e   : > { %v944_v47 = vmul.f32 %v916_v22, %v3885_v0  ;;  %v945_v24 = vmul.f32 %v916_v22, %v3888_v1 }
 0x33f   : > { %3542 = vpow2.f32 %v1030_v30 }
 0x340   : > { %3544 = vpow2.f32 %v1032_v31  ;;  %v957_v7 = vpop.permute.xlu1 %956  ;;  %v982_v33 = vpop.permute.xlu0 %981 }
 0x341   : > { %v4158_v35 = vadd.f32 %v957_v7, %v938_v32  ;;  %v4160_v40 = vadd.f32 %v957_v7, %v939_v6  ;;  %v4164_v2 = vadd.f32 %v982_v33, %v948_v34  ;;  %v4174_v55 = vadd.f32 %v982_v33, %v949_v46 }
 0x343   : > { %v1010_v41 = vsub.f32 0.0, %v4158_v35  ;;  %v1011_v42 = vsub.f32 0.0, %v4160_v40  ;;  %v1020_v50 = vsub.f32 0.0, %v4164_v2 }
 0x344   : > { %v911_v43 = vpop.permute.xlu1 %910  ;;  %v936_v4 = vpop.permute.xlu0 %935 }
 0x345   : > { %v1026_v44 = vmul.f32 1.442695, %v1010_v41  ;;  %v1028_v45 = vmul.f32 1.442695, %v1011_v42  ;;  %v942_v25 = vmul.f32 %v911_v43, %v3917_v14  ;;  %v943_v58 = vmul.f32 %v911_v43, %v3920_v15 }
 0x346   : > { %v952_v59 = vmul.f32 %v936_v4, %v3957_v36  ;;  %v1046_v61 = vmul.f32 1.442695, %v1020_v50  ;;  %v1021_v14 = vsub.f32 0.0, %v4174_v55  ;;  %v953_v16 = vmul.f32 %v936_v4, %v3960_v37 }
 0x347   : > { %3546 = vpow2.f32 %v1026_v44 }
 0x348   : > { %3548 = vpow2.f32 %v1028_v45  ;;  %v972_v48 = vpop.permute.xlu1 %971  ;;  %v992_v57 = vpop.permute.xlu0 %991  ;;  %v1048_v31 = vmul.f32 1.442695, %v1021_v14 }
 0x349   : > { %v3543_v49 = vpop.eup %3542  ;;  %v4170_v51 = vadd.f32 %v972_v48, %v944_v47  ;;  %v4172_v52 = vadd.f32 %v972_v48, %v945_v24  ;;  %v4198_v15 = vadd.f32 %v992_v57, %v952_v59  ;;  %v4207_v32 = vadd.f32 %v992_v57, %v953_v16 }
 0x34a   : > { %v3545_v53 = vpop.eup %3544  ;;  %v1060_v54 = vadd.f32 1.0, %v3543_v49 }
 0x34b   : > { %v1061_v56 = vadd.f32 1.0, %v3545_v53  ;;  %v1016_v0 = vsub.f32 0.0, %v4170_v51  ;;  %v1017_v1 = vsub.f32 0.0, %v4172_v52  ;;  %v1024_v6 = vsub.f32 0.0, %v4198_v15 }
 0x34c   : > { %3550 = vrcp.f32 %v1060_v54  ;;  %v967_v60 = vpop.permute.xlu1 %966  ;;  %v1025_v4 = vsub.f32 0.0, %v4207_v32 }
 0x34d   : > { %3552 = vrcp.f32 %v1061_v56  ;;  %v1038_v11 = vmul.f32 1.442695, %v1016_v0  ;;  %v1040_v12 = vmul.f32 1.442695, %v1017_v1  ;;  %v4200_v36 = vadd.f32 %v967_v60, %v942_v25 }
 0x34e   : > { %v4202_v13 = vadd.f32 %v967_v60, %v943_v58  ;;  %v1054_v46 = vmul.f32 1.442695, %v1024_v6  ;;  %v1056_v25 = vmul.f32 1.442695, %v1025_v4 }
 0x34f   : > { %3554 = vpow2.f32 %v1038_v11  ;;  %v1014_v17 = vsub.f32 0.0, %v4200_v36 }
 0x350   : > { %3556 = vpow2.f32 %v1040_v12  ;;  %v921_v20 = vpop.permute.xlu1 %920  ;;  %v1015_v22 = vsub.f32 0.0, %v4202_v13 }
 0x351   : > { %v3547_v21 = vpop.eup %3546  ;;  %3558 = vpow2.f32 %v1046_v61  ;;  %v946_v33 = vmul.f32 %v921_v20, %v3939_v26  ;;  %v947_v37 = vmul.f32 %v921_v20, %v3942_v27  ;;  %v1034_v34 = vmul.f32 1.442695, %v1014_v17 }
 0x352   : > { %v3549_v23 = vpop.eup %3548  ;;  %v1058_v30 = vadd.f32 1.0, %v3547_v21  ;;  %v1036_v42 = vmul.f32 1.442695, %v1015_v22 }
 0x353   : > { %v1059_v7 = vadd.f32 1.0, %v3549_v23 }
 0x354   : > { %3560 = vrcp.f32 %v1058_v30  ;;  %v977_v41 = vpop.permute.xlu1 %976 }
 0x355   : > { %3562 = vrcp.f32 %v1059_v7  ;;  %v4212_v43 = vadd.f32 %v977_v41, %v946_v33  ;;  %v4214_v44 = vadd.f32 %v977_v41, %v947_v37 }
 0x356   : > { %v3551_v45 = vpop.eup %3550  ;;  %3564 = vpow2.f32 %v1048_v31 }
 0x357   : > { %v3553_v47 = vpop.eup %3552  ;;  %v1018_v24 = vsub.f32 0.0, %v4212_v43  ;;  %v1108_v26 = vmul.f32 %v3551_v45, %v4149_v18  ;;  %3566 = vpow2.f32 %v1034_v34  ;;  %v1019_v27 = vsub.f32 0.0, %v4214_v44 }
 0x358   : > { %v931_v48 = vpop.permute.xlu1 %930  ;;  %v1109_v49 = vmul.f32 %v3553_v47, %v4151_v19  ;;  %3568 = vpow2.f32 %v1036_v42 }
 0x359   : > { %v3555_v50 = vpop.eup %3554  ;;  %v1042_v53 = vmul.f32 1.442695, %v1018_v24  ;;  %1167 = vrot.lane.b32.xlu1 %v1108_v26, %s3716_s10  ;;  %3570 = vpow2.f32 %v1054_v46  ;;  %v950_v1 = vmul.f32 %v931_v48, %v3963_v38  ;;  %v951_v57 = vmul.f32 %v931_v48, %v3966_v39 }
 0x35a   : > { %v3557_v54 = vpop.eup %3556  ;;  %v1064_v56 = vadd.f32 1.0, %v3555_v50  ;;  %1169 = vrot.lane.b32.xlu0 %v1109_v49, %s3716_s10  ;;  %v1044_v19 = vmul.f32 1.442695, %v1019_v27 }
 0x35b   : > { %v3559_v0 = vpop.eup %3558  ;;  %v1065_v18 = vadd.f32 1.0, %v3557_v54  ;;  %3572 = vpow2.f32 %v1042_v53 }
 0x35c   : > { %3574 = vrcp.f32 %v1064_v56  ;;  %v987_v58 = vpop.permute.xlu1 %986  ;;  %v1068_v11 = vadd.f32 1.0, %v3559_v0 }
 0x35d   : > { %3576 = vrcp.f32 %v1065_v18  ;;  %v4225_v59 = vadd.f32 %v987_v58, %v950_v1  ;;  %v4227_v60 = vadd.f32 %v987_v58, %v951_v57 }
 0x35e   : > { %v3561_v61 = vpop.eup %3560  ;;  %3578 = vpow2.f32 %v1056_v25 }
 0x35f   : > { %v3563_v12 = vpop.eup %3562  ;;  %v1022_v14 = vsub.f32 0.0, %v4225_v59  ;;  %v1023_v16 = vsub.f32 0.0, %v4227_v60  ;;  %v1106_v38 = vmul.f32 %v3561_v61, %v4158_v35  ;;  %3580 = vpow2.f32 %v1044_v19 }
 0x360   : > { %v3565_v17 = vpop.eup %3564  ;;  %v1107_v39 = vmul.f32 %v3563_v12, %v4160_v40  ;;  %3582 = vrcp.f32 %v1068_v11 }
 0x361   : > { %v1050_v20 = vmul.f32 1.442695, %v1022_v14  ;;  %v1052_v21 = vmul.f32 1.442695, %v1023_v16  ;;  %1163 = vrot.lane.b32.xlu1 %v1106_v38, %s3716_s10  ;;  %v2961_v22 = vpack.c.bf16 %v1108_v26, %v1106_v38  ;;  %v3567_v23 = vpop.eup %3566  ;;  %v1069_v6 = vadd.f32 1.0, %v3565_v17 }
 0x362   : > { %1165 = vrot.lane.b32.xlu0 %v1107_v39, %s3716_s10  ;;  %v2959_v30 = vpack.c.bf16 %v1109_v49, %v1107_v39  ;;  %v3569_v31 = vpop.eup %3568  ;;  %v1062_v7 = vadd.f32 1.0, %v3567_v23 }
 0x363   : > { %3584 = vpow2.f32 %v1050_v20  ;;  %v3571_v33 = vpop.eup %3570  ;;  %v1063_v35 = vadd.f32 1.0, %v3569_v31 }
 0x364   : > { %3586 = vpow2.f32 %v1052_v21  ;;  %2960 = vmatprep.subr.bf16.mxu0 %v2959_v30  ;;  %v1072_v47 = vadd.f32 1.0, %v3571_v33  ;;  %v1269_v33 = vld [vmem:[%s5536_s7] sm:$0x3] }
 0x365   : > { %v3573_v37 = vpop.eup %3572  ;;  %3588 = vrcp.f32 %v1062_v7  ;;  %2962 = vmatpush1.bf16.msra.mxu0 %v2961_v22 }
 0x366   : > { %v3575_v40 = vpop.eup %3574  ;;  %3590 = vrcp.f32 %v1063_v35  ;;  %v1066_v34 = vadd.f32 1.0, %v3573_v37  ;;  %v4293_v37 = vrot.slane %v1269_v33, %v4010_v29 }
 0x367   : > { %v3577_v41 = vpop.eup %3576  ;;  %3592 = vrcp.f32 %v1069_v6  ;;  %v1112_v42 = vmul.f32 %v3575_v40, %v4170_v51 }
 0x368   : > { %v3579_v45 = vpop.eup %3578  ;;  %3594 = vrcp.f32 %v1066_v34  ;;  %v1113_v4 = vmul.f32 %v3577_v41, %v4172_v52 }
 0x369   : > { %1175 = vrot.lane.b32.xlu1 %v1112_v42, %s3716_s10  ;;  %v3581_v46 = vpop.eup %3580  ;;  %v1073_v24 = vadd.f32 1.0, %v3579_v45 }
 0x36a   : > { %1177 = vrot.lane.b32.xlu0 %v1113_v4, %s3716_s10  ;;  %v1067_v26 = vadd.f32 1.0, %v3581_v46  ;;  %v3583_v27 = vpop.eup %3582 }
 0x36b   : > { %v1116_v57 = vmul.f32 %v3583_v27, %v4164_v2  ;;  %v4318_v27 = vsel %vm1320_vm6, %v4139_v5, %v4141_v8 }
 0x36c   : > { %3596 = vrcp.f32 %v1067_v26 }
 0x36d   : > { %v3585_v48 = vpop.eup %3584  ;;  %3598 = vrcp.f32 %v1072_v47 }
 0x36e   : > { %v3587_v49 = vpop.eup %3586  ;;  %v1070_v50 = vadd.f32 1.0, %v3585_v48  ;;  %3600 = vrcp.f32 %v1073_v24 }
 0x36f   : > { %v3589_v53 = vpop.eup %3588  ;;  %v1071_v51 = vadd.f32 1.0, %v3587_v49  ;;  %v4323_v49 = vrot.slane %v1269_v33, %v4008_v28 }
 0x370   : > { %v3591_v54 = vpop.eup %3590  ;;  %3602 = vrcp.f32 %v1070_v50  ;;  %v1110_v52 = vmul.f32 %v3589_v53, %v4200_v36 }
 0x371   : > { %v3593_v56 = vpop.eup %3592  ;;  %3604 = vrcp.f32 %v1071_v51  ;;  %v1111_v25 = vmul.f32 %v3591_v54, %v4202_v13 }
 0x372   : > { %v3595_v0 = vpop.eup %3594  ;;  %v2965_v18 = vpack.c.bf16 %v1112_v42, %v1110_v52  ;;  %1171 = vrot.lane.b32.xlu1 %v1110_v52, %s3716_s10  ;;  %v1117_v19 = vmul.f32 %v3593_v56, %v4174_v55  ;;  %v4300_v42 = vsel %vm1452_vm5, %v4135_v63, %v4137_v3 }
 0x373   : > { %1173 = vrot.lane.b32.xlu0 %v1111_v25, %s3716_s10  ;;  %v2963_v1 = vpack.c.bf16 %v1113_v4, %v1111_v25  ;;  %v1114_v58 = vmul.f32 %v3595_v0, %v4212_v43 }
 0x375   : > { %2964 = vmatprep.subr.bf16.mxu0 %v2963_v1  ;;  %v2969_v12 = vpack.c.bf16 %v1116_v57, %v1114_v58 }
 0x376   : > { %2966 = vmatpush1.bf16.msra.mxu0 %v2965_v18  ;;  %1183 = vrot.lane.b32.xlu1 %v1116_v57, %s3716_s10  ;;  %v3597_v36 = vpop.eup %3596 }
 0x377   : > { %1185 = vrot.lane.b32.xlu0 %v1117_v19, %s3716_s10  ;;  %v3599_v13 = vpop.eup %3598  ;;  %v1115_v61 = vmul.f32 %v3597_v36, %v4214_v44 }
 0x378   : > { %v3601_v11 = vpop.eup %3600  ;;  %v1120_v55 = vmul.f32 %v3599_v13, %v4198_v15  ;;  %v4259_v15 = vpop.permute.xlu1 %1360 }
 0x379   : > { %v2967_v2 = vpack.c.bf16 %v1117_v19, %v1115_v61  ;;  %v1121_v38 = vmul.f32 %v3601_v11, %v4207_v32 }
 0x37a   : > { %v3603_v14 = vpop.eup %3602  ;;  %1179 = vrot.lane.b32.xlu1 %v1114_v58, %s3716_s10 }
 0x37b   : > { %v3605_v16 = vpop.eup %3604  ;;  %1181 = vrot.lane.b32.xlu0 %v1115_v61, %s3716_s10  ;;  %v1118_v43 = vmul.f32 %v3603_v14, %v4225_v59  ;;  %2968 = vmatprep.subr.bf16.mxu0 %v2967_v2  ;;  %v4261_v59 = vpop.permute.xlu0 %1362 }
 0x37c   : > { %v1119_v17 = vmul.f32 %v3605_v16, %v4227_v60  ;;  %2970 = vmatpush1.bf16.msra.mxu0 %v2969_v12  ;;  %v4263_v32 = vpop.permute.xlu1 %1535  ;;  %v4361_v2 = vsel %vm1364_vm7, %v4259_v15, %v4261_v59 }
 0x37d   : > { %v2973_v44 = vpack.c.bf16 %v1120_v55, %v1118_v43 }
 0x37e   : > { %1191 = vrot.lane.b32.xlu1 %v1120_v55, %s3716_s10  ;;  %v2971_v39 = vpack.c.bf16 %v1121_v38, %v1119_v17 }
 0x37f   : > { %1193 = vrot.lane.b32.xlu0 %v1121_v38, %s3716_s10  ;;  %v4265_v60 = vpop.permute.xlu0 %1537 }
 0x380   : > { %2972 = vmatprep.subr.bf16.mxu0 %v2971_v39  ;;  %v4267_v20 = vpop.permute.xlu1 %1404 }
 0x381   : > { %2974 = vmatpush1.bf16.msra.mxu0 %v2973_v44 }
 0x382   : > { %1187 = vrot.lane.b32.xlu1 %v1118_v43, %s3716_s10 }
 0x383   : > { %1189 = vrot.lane.b32.xlu0 %v1119_v17, %s3716_s10  ;;  %v4269_v21 = vpop.permute.xlu0 %1406  ;;  %v4371_v17 = vsel %vm623_vm1, %v4143_v9, %v4145_v10  ;;  %vm2313_vm1 = vcmask 769024  }
 0x384   : > { %5570 = vst [vmem:[#allocation9_spill] sm:$0xff] %v4269_v21  ;;  %v4271_v22 = vpop.permute.xlu1 %1579 }
 0x387   : > { %v4273_v23 = vpop.permute.xlu0 %1581 }
 0x388   : > { %v4279_v6 = vsel %vm1124_vm2, %v4271_v22, %v4273_v23 }
 0x3cb   : > { %v1168_v30 = vpop.permute.xlu1 %1167 }
 0x3cc   : > { %1232 = vst.msk [vmem:[#allocation2 + $0x18] sm:$0xff] %vm1228_vm3, %v1168_v30  ;;  %v1170_v31 = vpop.permute.xlu0 %1169 }
 0x3cd   : > { %v4282_v7 = vsel %vm1195_vm4, %v1168_v30, %v1170_v31  ;;  %1234 = vst.msk [vmem:[#allocation2 + $0x28] sm:$0xff] %vm1195_vm4, %v1170_v31 }
 0x3ce   : > { %v4290_v35 = vmul.f32 %v4279_v6, %v4282_v7  ;;  %v1461_v4 = vmul.f32 %v4300_v42, %v4282_v7  ;;  %v1284_v47 = vmul.f32 %v4293_v37, %v4282_v7  ;;  %v1329_v53 = vmul.f32 %v4318_v27, %v4282_v7 }
 0x3cf   : > { %v1373_v16 = vmul.f32 %v4361_v2, %v4282_v7  ;;  %v1504_v30 = vmul.f32 %v4371_v17, %v4282_v7 }
 0x3d0   : > { %5571 = vst [vmem:[#allocation10_spill] sm:$0xff] %v4290_v35 }
 0x3d3   : > { %v1164_v40 = vpop.permute.xlu1 %1163  ;;  %v4320_v48 = vld [vmem:[#allocation2 + $0x18] sm:$0xff] }
 0x3d4   : > { %1229 = vst.msk [vmem:[#allocation2] sm:$0xff] %vm1228_vm3, %v1164_v40  ;;  %v1166_v34 = vpop.permute.xlu0 %1165  ;;  %v4296_v41 = vld [vmem:[#allocation2 + $0x28] sm:$0xff]  ;;  %v1460_v56 = vmul.f32 %v4135_v63, %v4320_v48  ;;  %v1503_v25 = vmul.f32 %v4143_v9, %v4320_v48  ;;  %v1283_v19 = vmul.f32 %v4323_v49, %v4320_v48  ;;  %v1328_v14 = vmul.f32 %v4139_v5, %v4320_v48 }
 0x3d5   : > { %v4303_v45 = vsel %vm1195_vm4, %v1164_v40, %v1166_v34  ;;  %1231 = vst.msk [vmem:[#allocation2 + $0x10] sm:$0xff] %vm1195_vm4, %v1166_v34  ;;  %v1462_v29 = vmul.f32 %v4137_v3, %v4296_v41  ;;  %v1330_v26 = vmul.f32 %v4141_v8, %v4296_v41  ;;  %v1374_v12 = vmul.f32 %v4261_v59, %v4296_v41 }
 0x3d6   : > { %v1282_v46 = vmul.f32 %v4293_v37, %v4303_v45  ;;  %v4336_v28 = vmul.f32 %v4279_v6, %v4303_v45  ;;  %v1505_v43 = vmul.f32 %v4145_v10, %v4296_v41  ;;  %v1547_v33 = vmul.f32 %v4263_v32, %v4320_v48 }
 0x3d7   : > { %v3112_v24 = vpack.i.bf16 %v1462_v29, %v1461_v4  ;;  %v3122_v54 = vpack.i.bf16 %v1330_v26, %v1329_v53  ;;  %v3142_v38 = vpack.i.bf16 %v1374_v12, %v1373_v16  ;;  %v1372_v53 = vmul.f32 %v4259_v15, %v4320_v48 }
 0x3d8   : > { %v2895_v50 = vpack.c.bf16 %v1284_v47, %v1282_v46  ;;  %5572 = vst [vmem:[#allocation11_spill] sm:$0xff] %v4336_v28  ;;  %v3132_v34 = vpack.i.bf16 %v1505_v43, %v1504_v30  ;;  %v1418_v46 = vmul.f32 %v4269_v21, %v4296_v41  ;;  %v1501_v16 = vmul.f32 %v4371_v17, %v4303_v45 }
 0x3d9   : > { %3113 = vrot.lane.b32.xlu0 %v3112_v24, %s3717_s21 }
 0x3da   : > { %2896 = vmatprep.subr.bf16.mxu1 %v2895_v50 }
 0x3db   : > { %v1176_v51 = vpop.permute.xlu1 %1175  ;;  %v4328_v52 = vld [vmem:[#allocation2] sm:$0xff] }
 0x3dc   : > { %1238 = vst.msk [vmem:[#allocation2 + $0x48] sm:$0xff] %vm1228_vm3, %v1176_v51  ;;  %v1178_v0 = vpop.permute.xlu0 %1177  ;;  %v1457_v18 = vmul.f32 %v4135_v63, %v4328_v52  ;;  %v1500_v1 = vmul.f32 %v4143_v9, %v4328_v52  ;;  %v1281_v57 = vmul.f32 %v4323_v49, %v4328_v52  ;;  %v1325_v11 = vmul.f32 %v4139_v5, %v4328_v52  ;;  %v4394_v26 = vld [vmem:[#allocation2 + $0x10] sm:$0xff] }
 0x3dd   : > { %v4348_v58 = vsel %vm1195_vm4, %v1176_v51, %v1178_v0  ;;  %1240 = vst.msk [vmem:[#allocation2 + $0x58] sm:$0xff] %vm1195_vm4, %v1178_v0  ;;  %3123 = vrot.lane.b32.xlu0 %v3122_v54, %s3718_s23  ;;  %v1544_v44 = vmul.f32 %v4263_v32, %v4328_v52  ;;  %v1369_v4 = vmul.f32 %v4259_v15, %v4328_v52 }
 0x3de   : > { %v3117_v36 = vpack.i.bf16 %v1460_v56, %v1457_v18  ;;  %v3137_v13 = vpack.i.bf16 %v1503_v25, %v1500_v1  ;;  %v2897_v61 = vpack.c.bf16 %v1283_v19, %v1281_v57  ;;  %v3127_v55 = vpack.i.bf16 %v1328_v14, %v1325_v11 }
 0x3df   : > { %v3157_v29 = vpack.i.bf16 %v1547_v33, %v1544_v44  ;;  %v1288_v24 = vmul.f32 %v4293_v37, %v4348_v58  ;;  %v4401_v51 = vsel %vm1408_vm8, %v4267_v20, %v4269_v21  ;;  %v1549_v0 = vmul.f32 %v4265_v60, %v4296_v41 }
 0x3e0   : > { %3118 = vrot.lane.b32.xlu1 %v3117_v36, %s3717_s21  ;;  %2898 = vmatpush1.bf16.msra.mxu1 %v2897_v61  ;;  %5573 = vst [vmem:[#allocation12_spill] sm:$0xff] %v4401_v51  ;;  %v1417_v56 = vmul.f32 %v4401_v51, %v4282_v7  ;;  %v3147_v1 = vpack.i.bf16 %v1372_v53, %v1369_v4 }
 0x3e1   : > { %3138 = vrot.lane.b32.xlu0 %v3137_v13, %s3719_s19  ;;  %v1502_v19 = vmul.f32 %v4145_v10, %v4394_v26  ;;  %v4419_v36 = vmul.f32 %v4273_v23, %v4394_v26  ;;  %v4424_v61 = vsel %vm1539_vm9, %v4263_v32, %v4265_v60  ;;  %v1413_v33 = vmul.f32 %v4267_v20, %v4328_v52 }
 0x3e2   : > { %v3162_v13 = vpack.i.bf16 %v1418_v46, %v1417_v56  ;;  %v1548_v14 = vmul.f32 %v4424_v61, %v4282_v7  ;;  %v1546_v4 = vmul.f32 %v4265_v60, %v4394_v26  ;;  %v1545_v53 = vmul.f32 %v4424_v61, %v4303_v45 }
 0x3e3   : > { %v4413_v57 = vld [vmem:[#allocation2 + $0x48] sm:$0xff]  ;;  %5574 = vst [vmem:[#allocation13_spill] sm:$0xff] %v4419_v36 }
 0x3e4   : > { %v1172_v39 = vpop.permute.xlu1 %1171  ;;  %3128 = vrot.lane.b32.xlu1 %v3127_v55, %s3718_s23  ;;  %v1287_v7 = vmul.f32 %v4323_v49, %v4413_v57  ;;  %v3152_v30 = vpack.i.bf16 %v1549_v0, %v1548_v14 }
 0x3e5   : > { %1235 = vst.msk [vmem:[#allocation2 + $0x30] sm:$0xff] %vm1228_vm3, %v1172_v39  ;;  %v1174_v31 = vpop.permute.xlu0 %1173  ;;  %3143 = vrot.lane.b32.xlu0 %v3142_v38, %s3720_s25 }
 0x3e6   : > { %v4383_v40 = vsel %vm1195_vm4, %v1172_v39, %v1174_v31  ;;  %1237 = vst.msk [vmem:[#allocation2 + $0x40] sm:$0xff] %vm1195_vm4, %v1174_v31  ;;  %v3182_v31 = vpack.i.bf16 %v1502_v19, %v1501_v16  ;;  %v3192_v19 = vpack.i.bf16 %v1546_v4, %v1545_v53  ;;  %v1327_v4 = vmul.f32 %v4141_v8, %v4394_v26 }
 0x3e7   : > { %v1286_v47 = vmul.f32 %v4293_v37, %v4383_v40  ;;  %v1326_v53 = vmul.f32 %v4318_v27, %v4303_v45  ;;  %v1507_v62 = vmul.f32 %v4371_v17, %v4383_v40  ;;  %v4668_v43 = vmul.f32 %v4279_v6, %v4383_v40 }
 0x3e8   : > { %v1184_v50 = vpop.permute.xlu1 %1183  ;;  %3133 = vrot.lane.b32.xlu1 %v3132_v34, %s3719_s19 }
 0x3e9   : > { %1244 = vst.msk [vmem:[#allocation2 + $0x78] sm:$0xff] %vm1228_vm3, %v1184_v50  ;;  %v1186_v54 = vpop.permute.xlu0 %1185  ;;  %3158 = vrot.lane.b32.xlu0 %v3157_v29, %s3721_s16  ;;  %v2899_v25 = vpack.c.bf16 %v1288_v24, %v1286_v47  ;;  %v1416_v24 = vmul.f32 %v4267_v20, %v4320_v48  ;;  %5584 = vst [vmem:[#allocation23_spill] sm:$0xff] %v4668_v43 }
 0x3ea   : > { %v4410_v18 = vsel %vm1195_vm4, %v1184_v50, %v1186_v54  ;;  %1246 = vst.msk [vmem:[#allocation2 + $0x88] sm:$0xff] %vm1195_vm4, %v1186_v54 }
 0x3eb   : > { %2900 = vmatprep.subr.bf16.mxu1 %v2899_v25  ;;  %v4435_v55 = vmul.f32 %v4424_v61, %v4410_v18  ;;  %v1292_v46 = vmul.f32 %v4293_v37, %v4410_v18  ;;  %v3167_v25 = vpack.i.bf16 %v1416_v24, %v1413_v33 }
 0x3ec   : > { %v1180_v11 = vpop.permute.xlu1 %1179  ;;  %3148 = vrot.lane.b32.xlu1 %v3147_v1, %s3720_s25  ;;  %v4427_v12 = vld [vmem:[#allocation2 + $0x30] sm:$0xff]  ;;  %v1459_v1 = vmul.f32 %v4137_v3, %v4394_v26 }
 0x3ed   : > { %1241 = vst.msk [vmem:[#allocation2 + $0x60] sm:$0xff] %vm1228_vm3, %v1180_v11  ;;  %v1182_v38 = vpop.permute.xlu0 %1181  ;;  %3163 = vrot.lane.b32.xlu0 %v3162_v13, %s3722_s24  ;;  %v1285_v44 = vmul.f32 %v4323_v49, %v4427_v12  ;;  %v1463_v13 = vmul.f32 %v4135_v63, %v4427_v12  ;;  %v4685_v35 = vmul.f32 %v4271_v22, %v4427_v12 }
 0x3ee   : > { %v4446_v39 = vsel %vm1195_vm4, %v1180_v11, %v1182_v38  ;;  %1243 = vst.msk [vmem:[#allocation2 + $0x70] sm:$0xff] %vm1195_vm4, %v1182_v38  ;;  %v4474_v11 = vld [vmem:[#allocation2 + $0x58] sm:$0xff]  ;;  %v1458_v38 = vmul.f32 %v4300_v42, %v4303_v45 }
 0x3ef   : > { %v2901_v34 = vpack.c.bf16 %v1287_v7, %v1285_v44  ;;  %v1290_v29 = vmul.f32 %v4293_v37, %v4446_v39  ;;  %v1555_v43 = vmul.f32 %v4265_v60, %v4474_v11 }
 0x3f0   : > { %v1192_v47 = vpop.permute.xlu1 %1191  ;;  %3153 = vrot.lane.b32.xlu1 %v3152_v30, %s3721_s16  ;;  %v4468_v0 = vld [vmem:[#allocation2 + $0x78] sm:$0xff] }
 0x3f1   : > { %1250 = vst.msk [vmem:[#allocation2 + $0xa8] sm:$0xff] %vm1228_vm3, %v1192_v47  ;;  %v1194_v50 = vpop.permute.xlu0 %1193  ;;  %2902 = vmatpush1.bf16.msra.mxu1 %v2901_v34  ;;  %3183 = vrot.lane.b32.xlu0 %v3182_v31, %s3719_s19  ;;  %v2903_v54 = vpack.c.bf16 %v1292_v46, %v1290_v29  ;;  %v1291_v30 = vmul.f32 %v4323_v49, %v4468_v0  ;;  %v4662_v36 = vld [vmem:[#allocation2 + $0x88] sm:$0xff] }
 0x3f2   : > { %v4465_v56 = vsel %vm1195_vm4, %v1192_v47, %v1194_v50  ;;  %1252 = vst.msk [vmem:[#allocation2 + $0xb8] sm:$0xff] %vm1195_vm4, %v1194_v50  ;;  %v1466_v31 = vmul.f32 %v4135_v63, %v4413_v57  ;;  %v3172_v34 = vpack.i.bf16 %v1459_v1, %v1458_v38  ;;  %v1336_v29 = vmul.f32 %v4141_v8, %v4474_v11 }
 0x3f3   : > { %2904 = vmatprep.subr.bf16.mxu1 %v2903_v54  ;;  %v1296_v50 = vmul.f32 %v4293_v37, %v4465_v56  ;;  %v1335_v54 = vmul.f32 %v4318_v27, %v4348_v58  ;;  %v3177_v1 = vpack.i.bf16 %v1327_v4, %v1326_v53  ;;  %v1468_v53 = vmul.f32 %v4137_v3, %v4474_v11 }
 0x3f4   : > { %v1188_v14 = vpop.permute.xlu1 %1187  ;;  %3168 = vrot.lane.b32.xlu1 %v3167_v25, %s3722_s24  ;;  %v4477_v16 = vld [vmem:[#allocation2 + $0x60] sm:$0xff]  ;;  %v3207_v47 = vpack.i.bf16 %v1466_v31, %v1463_v13  ;;  %v1371_v13 = vmul.f32 %v4261_v59, %v4394_v26  ;;  %v1509_v31 = vmul.f32 %v4143_v9, %v4413_v57 }
 0x3f5   : > { %1247 = vst.msk [vmem:[#allocation2 + $0x90] sm:$0xff] %vm1228_vm3, %v1188_v14  ;;  %v1190_v44 = vpop.permute.xlu0 %1189  ;;  %3193 = vrot.lane.b32.xlu0 %v3192_v19, %s3721_s16  ;;  %v1289_v7 = vmul.f32 %v4323_v49, %v4477_v16 }
 0x3f6   : > { %v4490_v33 = vsel %vm1195_vm4, %v1188_v14, %v1190_v44  ;;  %1249 = vst.msk [vmem:[#allocation2 + $0xa0] sm:$0xff] %vm1195_vm4, %v1190_v44  ;;  %v3212_v14 = vpack.i.bf16 %v1336_v29, %v1335_v54  ;;  %v1370_v44 = vmul.f32 %v4361_v2, %v4303_v45  ;;  %v1414_v29 = vmul.f32 %v4401_v51, %v4303_v45 }
 0x3f7   : > { %v2905_v46 = vpack.c.bf16 %v1291_v30, %v1289_v7  ;;  %v1294_v24 = vmul.f32 %v4293_v37, %v4490_v33  ;;  %v1506_v37 = vmul.f32 %v4143_v9, %v4427_v12  ;;  %v1379_v45 = vmul.f32 %v4361_v2, %v4348_v58 }
 0x3f8   : > { %3173 = vrot.lane.b32.xlu1 %v3172_v34, %s3717_s21  ;;  %v4507_v19 = vld [vmem:[#allocation2 + $0xa8] sm:$0xff]  ;;  %v1415_v34 = vmul.f32 %v4269_v21, %v4394_v26  ;;  %v3187_v4 = vpack.i.bf16 %v1371_v13, %v1370_v44  ;;  %v4541_v26 = vmul.f32 %v4271_v22, %v4320_v48  ;;  %v4550_v54 = vmul.f32 %v4318_v27, %v4446_v39 }
 0x3f9   : > { %2906 = vmatpush1.bf16.msra.mxu1 %v2905_v46  ;;  %3208 = vrot.lane.b32.xlu0 %v3207_v47, %s3717_s21  ;;  %v2907_v25 = vpack.c.bf16 %v1296_v50, %v1294_v24  ;;  %v1295_v30 = vmul.f32 %v4323_v49, %v4507_v19  ;;  %v1380_v46 = vmul.f32 %v4261_v59, %v4474_v11 }
 0x3fa   : > { %v4533_v47 = vmul.f32 %v4300_v42, %v4446_v39  ;;  %v3227_v50 = vpack.i.bf16 %v1509_v31, %v1506_v37  ;;  %5575 = vst [vmem:[#allocation14_spill] sm:$0xff] %v4541_v26  ;;  %v3197_v48 = vpack.i.bf16 %v1415_v34, %v1414_v29  ;;  %v4561_v13 = vmul.f32 %v4145_v10, %v4474_v11 }
 0x3fb   : > { %2908 = vmatprep.subr.bf16.mxu1 %v2907_v25  ;;  %v4554_v25 = vmul.f32 %v4273_v23, %v4296_v41  ;;  %v1553_v37 = vmul.f32 %v4263_v32, %v4413_v57  ;;  %v1334_v44 = vmul.f32 %v4139_v5, %v4413_v57  ;;  %v1510_v41 = vmul.f32 %v4371_v17, %v4348_v58 }
 0x3fc   : > { %3178 = vrot.lane.b32.xlu1 %v3177_v1, %s3718_s23  ;;  %v4514_v38 = vld [vmem:[#allocation2 + $0x90] sm:$0xff]  ;;  %v1467_v1 = vmul.f32 %v4300_v42, %v4348_v58  ;;  %v4575_v31 = vmul.f32 %v4300_v42, %v4465_v56  ;;  %v4624_v28 = vmul.f32 %v4259_v15, %v4507_v19 }
 0x3fd   : > { %3213 = vrot.lane.b32.xlu0 %v3212_v14, %s3718_s23  ;;  %v1293_v7 = vmul.f32 %v4323_v49, %v4514_v38  ;;  %v4537_v49 = vmul.f32 %v4318_v27, %v4465_v56  ;;  %5576 = vst [vmem:[#allocation15_spill] sm:$0xff] %v4554_v25  ;;  %v3232_v14 = vpack.i.bf16 %v1380_v46, %v1379_v45 }
 0x3fe   : > { %v4579_v34 = vmul.f32 %v4263_v32, %v4514_v38  ;;  %v3202_v29 = vpack.i.bf16 %v1468_v53, %v1467_v1  ;;  %v1464_v46 = vmul.f32 %v4300_v42, %v4383_v40  ;;  %v3222_v45 = vpack.i.bf16 %v4561_v13, %v1510_v41 }
 0x3ff   : > { %v2909_v24 = vpack.c.bf16 %v1295_v30, %v1293_v7  ;;  %v1550_v7 = vmul.f32 %v4263_v32, %v4427_v12  ;;  %v4571_v30 = vld [vmem:[#allocation2 + $0x40] sm:$0xff]  ;;  %v4602_v53 = vmul.f32 %v4139_v5, %v4507_v19  ;;  %v4618_v13 = vmul.f32 %v4259_v15, %v4514_v38 }
 0x400   : > { %3188 = vrot.lane.b32.xlu1 %v3187_v4, %s3720_s25  ;;  %v4583_v4 = vmul.f32 %v4271_v22, %v4328_v52  ;;  %v1331_v52 = vmul.f32 %v4139_v5, %v4427_v12  ;;  %v1465_v1 = vmul.f32 %v4137_v3, %v4571_v30  ;;  %v4712_v25 = vmul.f32 %v4269_v21, %v4662_v36 }
 0x401   : > { %2910 = vmatpush1.bf16.msra.mxu1 %v2909_v24  ;;  %3228 = vrot.lane.b32.xlu0 %v3227_v50, %s3719_s19  ;;  %v4590_v24 = vmul.f32 %v4263_v32, %v4507_v19  ;;  %v4594_v50 = vmul.f32 %v4139_v5, %v4514_v38  ;;  %5580 = vst [vmem:[#allocation19_spill] sm:$0xff] %v4618_v13  ;;  %v4704_v13 = vld [vmem:[#allocation2 + $0x70] sm:$0xff] }
 0x402   : > { %5577 = vst [vmem:[#allocation16_spill] sm:$0xff] %v4583_v4  ;;  %v3247_v41 = vpack.i.bf16 %v1553_v37, %v1550_v7  ;;  %v4635_v37 = vmul.f32 %v4424_v61, %v4465_v56  ;;  %v4639_v7 = vmul.f32 %v4401_v51, %v4348_v58  ;;  %v4652_v4 = vmul.f32 %v4371_v17, %v4490_v33 }
 0x403   : > { %5578 = vst [vmem:[#allocation17_spill] sm:$0xff] %v4594_v50  ;;  %v3252_v26 = vpack.i.bf16 %v1465_v1, %v1464_v46  ;;  %v4656_v50 = vmul.f32 %v4401_v51, %v4383_v40  ;;  %v4676_v46 = vmul.f32 %v4318_v27, %v4490_v33  ;;  %v1375_v1 = vmul.f32 %v4259_v15, %v4427_v12 }
 0x404   : > { %3198 = vrot.lane.b32.xlu1 %v3197_v48, %s3722_s24  ;;  %v4606_v48 = vmul.f32 %v4300_v42, %v4490_v33  ;;  %5581 = vst [vmem:[#allocation20_spill] sm:$0xff] %v4635_v37  ;;  %v3217_v37 = vpack.i.bf16 %v1334_v44, %v1331_v52  ;;  %v4672_v44 = vmul.f32 %v4273_v23, %v4571_v30 }
 0x405   : > { %3233 = vrot.lane.b32.xlu0 %v3232_v14, %s3720_s25  ;;  %v4614_v14 = vmul.f32 %v4371_v17, %v4465_v56  ;;  %5582 = vst [vmem:[#allocation21_spill] sm:$0xff] %v4656_v50  ;;  %5586 = vst [vmem:[#allocation25_spill] sm:$0xff] %v4676_v46  ;;  %v4692_v46 = vmul.f32 %v4271_v22, %v4413_v57  ;;  %v4724_v50 = vmul.f32 %v4273_v23, %v4474_v11 }
 0x406   : > { %5585 = vst [vmem:[#allocation24_spill] sm:$0xff] %v4672_v44  ;;  %v1474_v44 = vmul.f32 %v4137_v3, %v4662_v36 }
 0x407   : > { %5579 = vst [vmem:[#allocation18_spill] sm:$0xff] %v4614_v14  ;;  %v1508_v14 = vmul.f32 %v4145_v10, %v4571_v30 }
 0x408   : > { %3203 = vrot.lane.b32.xlu1 %v3202_v29, %s3717_s21  ;;  %v4646_v29 = vmul.f32 %v4269_v21, %v4474_v11 }
 0x409   : > { %3248 = vrot.lane.b32.xlu0 %v3247_v41, %s3721_s16  ;;  %v4660_v41 = vmul.f32 %v4269_v21, %v4571_v30  ;;  %v3262_v52 = vpack.i.bf16 %v1508_v14, %v1507_v62  ;;  %v4696_v62 = vmul.f32 %v4267_v20, %v4427_v12  ;;  %v4700_v14 = vmul.f32 %v4267_v20, %v4413_v57 }
 0x40a   : > { %v4716_v12 = vmul.f32 %v4279_v6, %v4348_v58  ;;  %v1378_v21 = vmul.f32 %v4259_v15, %v4413_v57  ;;  %v4746_v57 = vmul.f32 %v4279_v6, %v4446_v39 }
 0x40b   : > { %5583 = vst [vmem:[#allocation22_spill] sm:$0xff] %v4660_v41  ;;  %5587 = vst [vmem:[#allocation26_spill] sm:$0xff] %v4696_v62  ;;  %v1551_v41 = vmul.f32 %v4424_v61, %v4383_v40  ;;  %v1554_v62 = vmul.f32 %v4424_v61, %v4348_v58 }
 0x40c   : > { %3218 = vrot.lane.b32.xlu1 %v3217_v37, %s3718_s23  ;;  %5588 = vst [vmem:[#allocation27_spill] sm:$0xff] %v4700_v14  ;;  %v1552_v37 = vmul.f32 %v4265_v60, %v4571_v30  ;;  %5589 = vst [vmem:[#allocation28_spill] sm:$0xff] %v4716_v12  ;;  %v3237_v11 = vpack.i.bf16 %v1378_v21, %v1375_v1  ;;  %v4766_v12 = vmul.f32 %v4267_v20, %v4477_v16 }
 0x40d   : > { %3253 = vrot.lane.b32.xlu0 %v3252_v26, %s3717_s21  ;;  %v4708_v26 = vmul.f32 %v4401_v51, %v4410_v18  ;;  %v4728_v51 = vmul.f32 %v4424_v61, %v4490_v33  ;;  %5591 = vst [vmem:[#allocation30_spill] sm:$0xff] %v4746_v57  ;;  %v4770_v21 = vmul.f32 %v4267_v20, %v4468_v0 }
 0x40e   : > { %v3272_v14 = vpack.i.bf16 %v1552_v37, %v1551_v41  ;;  %5594 = vst [vmem:[#allocation33_spill] sm:$0xff] %v4766_v12  ;;  %v3242_v41 = vpack.i.bf16 %v1555_v43, %v1554_v62  ;;  %v1473_v1 = vmul.f32 %v4300_v42, %v4410_v18  ;;  %v4777_v37 = vmul.f32 %v4279_v6, %v4410_v18 }
 0x40f   : > { %5590 = vst [vmem:[#allocation29_spill] sm:$0xff] %v4728_v51  ;;  %v4750_v51 = vmul.f32 %v4273_v23, %v4704_v13  ;;  %5595 = vst [vmem:[#allocation34_spill] sm:$0xff] %v4770_v21  ;;  %v4790_v43 = vmul.f32 %v4279_v6, %v4490_v33  ;;  %v1333_v42 = vmul.f32 %v4141_v8, %v4571_v30 }
 0x410   : > { %3223 = vrot.lane.b32.xlu1 %v3222_v45, %s3719_s19  ;;  %v4762_v45 = vmul.f32 %v4271_v22, %v4468_v0  ;;  %v1342_v62 = vmul.f32 %v4141_v8, %v4662_v36  ;;  %v4804_v57 = vmul.f32 %v4267_v20, %v4507_v19  ;;  %v3277_v58 = vpack.i.bf16 %v1474_v44, %v1473_v1 }
 0x411   : > { %3263 = vrot.lane.b32.xlu0 %v3262_v52, %s3719_s19  ;;  %5592 = vst [vmem:[#allocation31_spill] sm:$0xff] %v4750_v51  ;;  %v4756_v52 = vmul.f32 %v4271_v22, %v4477_v16  ;;  %v4786_v51 = vmul.f32 %v4273_v23, %v4662_v36  ;;  %5596 = vst [vmem:[#allocation35_spill] sm:$0xff] %v4790_v43  ;;  %v4810_v12 = vmul.f32 %v4271_v22, %v4514_v38 }
 0x412   : > { %v4814_v21 = vmul.f32 %v4271_v22, %v4507_v19  ;;  %v4823_v44 = vmul.f32 %v4279_v6, %v4465_v56  ;;  %v1341_v1 = vmul.f32 %v4318_v27, %v4410_v18  ;;  %v1512_v6 = vmul.f32 %v4143_v9, %v4477_v16 }
 0x413   : > { %5593 = vst [vmem:[#allocation32_spill] sm:$0xff] %v4756_v52  ;;  %v1332_v52 = vmul.f32 %v4318_v27, %v4383_v40  ;;  %v1376_v27 = vmul.f32 %v4361_v2, %v4383_v40  ;;  %v1385_v40 = vmul.f32 %v4361_v2, %v4410_v18 }
 0x414   : > { %3238 = vrot.lane.b32.xlu1 %v3237_v11, %s3720_s25  ;;  %v4800_v11 = vmul.f32 %v4267_v20, %v4514_v38  ;;  %v3527_v22 = vpack.i.bf16 %v4814_v21, %v4810_v12  ;;  %v1377_v20 = vmul.f32 %v4261_v59, %v4571_v30  ;;  %v1469_v30 = vmul.f32 %v4135_v63, %v4477_v16 }
 0x415   : > { %3273 = vrot.lane.b32.xlu0 %v3272_v14, %s3721_s16  ;;  %v4796_v14 = vld [vmem:[#allocation2 + $0xb8] sm:$0xff]  ;;  %v3257_v43 = vpack.i.bf16 %v1333_v42, %v1332_v52  ;;  %v1515_v52 = vmul.f32 %v4143_v9, %v4468_v0 }
 0x416   : > { %5597 = vst [vmem:[#allocation36_spill] sm:$0xff] %v4800_v11  ;;  %v3287_v11 = vpack.i.bf16 %v1342_v62, %v1341_v1  ;;  %v3267_v42 = vpack.i.bf16 %v1377_v20, %v1376_v27  ;;  %v1386_v1 = vmul.f32 %v4261_v59, %v4662_v36  ;;  %v1337_v20 = vmul.f32 %v4139_v5, %v4477_v16 }
 0x417   : > { %v3302_v62 = vpack.i.bf16 %v1515_v52, %v1512_v6  ;;  %v1556_v6 = vmul.f32 %v4263_v32, %v4477_v16  ;;  %v1340_v52 = vmul.f32 %v4139_v5, %v4468_v0  ;;  %v1513_v5 = vmul.f32 %v4371_v17, %v4446_v39 }
 0x418   : > { %3243 = vrot.lane.b32.xlu1 %v3242_v41, %s3721_s16  ;;  %v4832_v41 = vmul.f32 %v4273_v23, %v4796_v14  ;;  %v3307_v27 = vpack.i.bf16 %v1386_v1, %v1385_v40  ;;  %v1514_v1 = vmul.f32 %v4145_v10, %v4704_v13  ;;  %v1516_v40 = vmul.f32 %v4371_v17, %v4410_v18 }
 0x419   : > { %3278 = vrot.lane.b32.xlu0 %v3277_v58, %s3717_s21  ;;  %v1557_v18 = vmul.f32 %v4424_v61, %v4446_v39  ;;  %v1561_v17 = vmul.f32 %v4265_v60, %v4662_v36  ;;  %v1471_v61 = vmul.f32 %v4137_v3, %v4704_v13 }
 0x41a   : > { %v3517_v58 = vpack.i.bf16 %v4832_v41, %v4823_v44 }
 0x41c   : > { %3258 = vrot.lane.b32.xlu1 %v3257_v43, %s3718_s23  ;;  %v1472_v43 = vmul.f32 %v4135_v63, %v4468_v0 }
 0x41d   : > { %3288 = vrot.lane.b32.xlu0 %v3287_v11, %s3718_s23 }
 0x41e   : > { %v3282_v11 = vpack.i.bf16 %v1472_v43, %v1469_v30  ;;  %v1517_v30 = vmul.f32 %v4145_v10, %v4662_v36  ;;  %v1348_v36 = vmul.f32 %v4141_v8, %v4796_v14 }
 0x420   : > { %3268 = vrot.lane.b32.xlu1 %v3267_v42, %s3720_s25  ;;  %v1559_v42 = vmul.f32 %v4263_v32, %v4468_v0  ;;  %v1381_v32 = vmul.f32 %v4259_v15, %v4477_v16  ;;  %v1475_v16 = vmul.f32 %v4135_v63, %v4514_v38 }
 0x421   : > { %3303 = vrot.lane.b32.xlu0 %v3302_v62, %s3719_s19  ;;  %v3292_v62 = vpack.i.bf16 %v1340_v52, %v1337_v20  ;;  %v3337_v20 = vpack.i.bf16 %v1514_v1, %v1513_v5  ;;  %v1521_v1 = vmul.f32 %v4143_v9, %v4507_v19 }
 0x422   : > { %v3322_v43 = vpack.i.bf16 %v1559_v42, %v1556_v6  ;;  %v1384_v6 = vmul.f32 %v4259_v15, %v4468_v0  ;;  %v1478_v15 = vmul.f32 %v4135_v63, %v4507_v19  ;;  %v3317_v0 = vpack.i.bf16 %v1561_v17, %v4435_v55  ;;  %v5599_v17 = vld [vmem:[#allocation17_spill] sm:$0xff] }
 0x423   : > { %v3362_v63 = vpack.i.bf16 %v1348_v36, %v4537_v49  ;;  %v1518_v55 = vmul.f32 %v4143_v9, %v4514_v38  ;;  %v1382_v38 = vmul.f32 %v4361_v2, %v4446_v39  ;;  %v1391_v49 = vmul.f32 %v4361_v2, %v4465_v56  ;;  %v5608_v36 = vld [vmem:[#allocation16_spill] sm:$0xff] }
 0x424   : > { %3283 = vrot.lane.b32.xlu1 %v3282_v11, %s3717_s21  ;;  %v3297_v11 = vpack.i.bf16 %v1517_v30, %v1516_v40  ;;  %v3312_v52 = vpack.i.bf16 %v1384_v6, %v1381_v32  ;;  %v3327_v30 = vpack.i.bf16 %v1471_v61, %v4533_v47  ;;  %v1383_v47 = vmul.f32 %v4261_v59, %v4704_v13  ;;  %v4925_v32 = vld [vmem:[#allocation2 + $0xa0] sm:$0xff] }
 0x425   : > { %3308 = vrot.lane.b32.xlu0 %v3307_v27, %s3720_s25  ;;  %v1558_v27 = vmul.f32 %v4265_v60, %v4704_v13  ;;  %v3377_v5 = vpack.i.bf16 %v1521_v1, %v1518_v55  ;;  %v1480_v19 = vmul.f32 %v4137_v3, %v4796_v14  ;;  %v5598_v6 = vpack.i.bf16 %v4590_v24, %v4579_v34  ;;  %v5602_v34 = vld [vmem:[#allocation13_spill] sm:$0xff]  ;;  %v5603_v24 = vld [vmem:[#allocation11_spill] sm:$0xff] }
 0x426   : > { %v3342_v9 = vpack.i.bf16 %v1383_v47, %v1382_v38  ;;  %v5612_v38 = vld [vmem:[#allocation15_spill] sm:$0xff] }
 0x427   : > { %v3347_v42 = vpack.i.bf16 %v1558_v27, %v1557_v18  ;;  %v1477_v27 = vmul.f32 %v4137_v3, %v4925_v32  ;;  %v1523_v18 = vmul.f32 %v4145_v10, %v4796_v14  ;;  %v5601_v3 = vld [vmem:[#allocation18_spill] sm:$0xff] }
 0x428   : > { %3293 = vrot.lane.b32.xlu1 %v3292_v62, %s3718_s23  ;;  %v3357_v62 = vpack.i.bf16 %v1478_v15, %v1475_v16  ;;  %v5604_v15 = vpack.i.bf16 %v5602_v34, %v5603_v24 }
 0x429   : > { %3323 = vrot.lane.b32.xlu0 %v3322_v43, %s3721_s16  ;;  %v1339_v43 = vmul.f32 %v4141_v8, %v4704_v13 }
 0x42b   : > { %v3332_v40 = vpack.i.bf16 %v1339_v43, %v4550_v54 }
 0x42c   : > { %3298 = vrot.lane.b32.xlu1 %v3297_v11, %s3719_s19  ;;  %v1392_v11 = vmul.f32 %v4261_v59, %v4796_v14 }
 0x42d   : > { %3338 = vrot.lane.b32.xlu0 %v3337_v20, %s3719_s19  ;;  %v3352_v20 = vpack.i.bf16 %v1480_v19, %v4575_v31  ;;  %v3372_v31 = vpack.i.bf16 %v1523_v18, %v5601_v3  ;;  %v1345_v19 = vmul.f32 %v4141_v8, %v4925_v32  ;;  %v5618_v18 = vld [vmem:[#allocation24_spill] sm:$0xff]  ;;  %v5621_v3 = vld [vmem:[#allocation25_spill] sm:$0xff] }
 0x42e   : > { %v3382_v54 = vpack.i.bf16 %v1392_v11, %v1391_v49  ;;  %v5613_v49 = vld [vmem:[#allocation10_spill] sm:$0xff] }
 0x42f   : > { %v3432_v8 = vpack.i.bf16 %v1345_v19, %v5621_v3 }
 0x430   : > { %3313 = vrot.lane.b32.xlu1 %v3312_v52, %s3720_s25  ;;  %v3402_v52 = vpack.i.bf16 %v1477_v27, %v4606_v48  ;;  %v1567_v48 = vmul.f32 %v4265_v60, %v4796_v14  ;;  %v5616_v27 = vld [vmem:[#allocation21_spill] sm:$0xff] }
 0x431   : > { %3348 = vrot.lane.b32.xlu0 %v3347_v42, %s3721_s16  ;;  %v5600_v42 = vpack.i.bf16 %v4602_v53, %v5599_v17  ;;  %v5605_v53 = vld [vmem:[#allocation19_spill] sm:$0xff] }
 0x432   : > { %v5606_v61 = vpack.i.bf16 %v4624_v28, %v5605_v53  ;;  %v5611_v28 = vpack.i.bf16 %v4646_v29, %v4639_v7  ;;  %v1564_v53 = vmul.f32 %v4265_v60, %v4925_v32  ;;  %v5627_v60 = vld [vmem:[#allocation9_spill] sm:$0xff] }
 0x434   : > { %3318 = vrot.lane.b32.xlu1 %v3317_v0, %s3721_s16 }
 0x435   : > { %3358 = vrot.lane.b32.xlu0 %v3357_v62, %s3717_s21  ;;  %v5607_v62 = vld [vmem:[#allocation14_spill] sm:$0xff] }
 0x438   : > { %3328 = vrot.lane.b32.xlu1 %v3327_v30, %s3717_s21  ;;  %v5609_v30 = vpack.i.bf16 %v5607_v62, %v5608_v36 }
 0x439   : > { %3363 = vrot.lane.b32.xlu0 %v3362_v63, %s3718_s23  ;;  %v5610_v63 = vld [vmem:[#allocation20_spill] sm:$0xff] }
 0x43a   : > { %v3392_v55 = vpack.i.bf16 %v1567_v48, %v5610_v63  ;;  %v5622_v48 = vpack.i.bf16 %v4692_v46, %v4685_v35  ;;  %v5624_v35 = vld [vmem:[#allocation27_spill] sm:$0xff]  ;;  %v5625_v46 = vld [vmem:[#allocation26_spill] sm:$0xff] }
 0x43c   : > { %3333 = vrot.lane.b32.xlu1 %v3332_v40, %s3718_s23  ;;  %v1520_v40 = vmul.f32 %v4145_v10, %v4925_v32 }
 0x43d   : > { %3378 = vrot.lane.b32.xlu0 %v3377_v5, %s3719_s19 }
 0x43e   : > { %v3442_v11 = vpack.i.bf16 %v1520_v40, %v4652_v4 }
 0x440   : > { %3343 = vrot.lane.b32.xlu1 %v3342_v9, %s3720_s25  ;;  %v5614_v9 = vpack.i.bf16 %v5612_v38, %v5613_v49  ;;  %v5626_v49 = vpack.i.bf16 %v5624_v35, %v5625_v46 }
 0x441   : > { %3383 = vrot.lane.b32.xlu0 %v3382_v54, %s3720_s25 }
 0x444   : > { %3353 = vrot.lane.b32.xlu1 %v3352_v20, %s3717_s21  ;;  %v5615_v20 = vld [vmem:[#allocation22_spill] sm:$0xff] }
 0x445   : > { %3398 = vrot.lane.b32.xlu0 %v5598_v6, %s3721_s16  ;;  %v5617_v6 = vpack.i.bf16 %v5615_v20, %v5616_v27 }
 0x448   : > { %3368 = vrot.lane.b32.xlu1 %v5600_v42, %s3718_s23 }
 0x449   : > { %3403 = vrot.lane.b32.xlu0 %v3402_v52, %s3717_s21  ;;  %v5619_v52 = vld [vmem:[#allocation23_spill] sm:$0xff] }
 0x44a   : > { %v5620_v17 = vpack.i.bf16 %v5618_v18, %v5619_v52  ;;  %v5048_v52 = vld [vmem:[%s5530_s1 + $0x8] sm:$0xff] }
 0x44b   : > { %v4945_v16 = vpop.permute.xlu0 %3113 }
 0x44c   : > { %3373 = vrot.lane.b32.xlu1 %v3372_v31, %s3719_s19  ;;  %v3115_v19 = vunpack.i.l.bf16 %v4945_v16 }
 0x44d   : > { %3408 = vrot.lane.b32.xlu0 %v5604_v15, %s3723_s26 }
 0x44f   : > { %v4954_v0 = vpop.permute.xlu0 %3123 }
 0x450   : > { %3388 = vrot.lane.b32.xlu1 %v5606_v61, %s3720_s25 }
 0x451   : > { %3418 = vrot.lane.b32.xlu0 %v5609_v30, %s3723_s26 }
 0x452   : > { %v4964_v43 = vpop.permute.xlu1 %3118 }
 0x453   : > { %v3139_v1 = vpop.permute.xlu0 %3138 }
 0x454   : > { %3393 = vrot.lane.b32.xlu1 %v3392_v55, %s3721_s16  ;;  %v3141_v7 = vunpack.i.h.bf16 %v3139_v1  ;;  %v5623_v55 = vld [vmem:[#allocation12_spill] sm:$0xff] }
 0x455   : > { %3428 = vrot.lane.b32.xlu0 %v5611_v28, %s3722_s24  ;;  %v1426_v40 = vmul.f32 %v5623_v55, %v4446_v39  ;;  %v3140_v28 = vunpack.i.l.bf16 %v3139_v1  ;;  %v5628_v39 = vpack.i.bf16 %v4712_v25, %v4708_v26  ;;  %v5629_v1 = vld [vmem:[#allocation29_spill] sm:$0xff] }
 0x456   : > { %v4974_v47 = vpop.permute.xlu1 %3128  ;;  %v3482_v20 = vpack.i.bf16 %v1564_v53, %v5629_v1  ;;  %v5630_v53 = vld [vmem:[#allocation28_spill] sm:$0xff]  ;;  %v3125_v1 = vunpack.i.l.bf16 %v4954_v0 }
 0x457   : > { %v4976_v5 = vpop.permute.xlu0 %3143 }
 0x458   : > { %3413 = vrot.lane.b32.xlu1 %v5614_v9, %s3723_s26  ;;  %v3145_v31 = vunpack.i.l.bf16 %v4976_v5  ;;  %v1427_v9 = vmul.f32 %v5627_v60, %v4704_v13 }
 0x459   : > { %3443 = vrot.lane.b32.xlu0 %v3442_v11, %s3719_s19 }
 0x45a   : > { %v3134_v10 = vpop.permute.xlu1 %3133 }
 0x45b   : > { %v3135_v29 = vunpack.i.l.bf16 %v3134_v10  ;;  %v3159_v54 = vpop.permute.xlu0 %3158  ;;  %v3136_v61 = vunpack.i.h.bf16 %v3134_v10  ;;  %v3116_v10 = vunpack.i.h.bf16 %v4945_v16 }
 0x45c   : > { %3423 = vrot.lane.b32.xlu1 %v5617_v6, %s3722_s24  ;;  %v3161_v36 = vunpack.i.h.bf16 %v3159_v54 }
 0x45d   : > { %v4991_v4 = vsel %vm2103_vm10, %v3141_v7, %v3135_v29  ;;  %3448 = vrot.lane.b32.xlu0 %v5620_v17, %s3723_s26  ;;  %v5043_v16 = vsel %vm2103_vm10, %v3135_v29, %v3136_v61  ;;  %v5631_v61 = vpack.i.bf16 %v4724_v50, %v5630_v53 }
 0x45e   : > { %v4997_v42 = vpop.permute.xlu1 %3148 }
 0x45f   : > { %v3151_v34 = vunpack.i.h.bf16 %v4997_v42  ;;  %v5002_v24 = vpop.permute.xlu0 %3163 }
 0x460   : > { %3433 = vrot.lane.b32.xlu1 %v3432_v8, %s3718_s23  ;;  %v3165_v25 = vunpack.i.l.bf16 %v5002_v24 }
 0x461   : > { %v5008_v15 = vsel %vm1788_vm11, %v3151_v34, %v3145_v31  ;;  %3458 = vrot.lane.b32.xlu0 %v5622_v48, %s3723_s26  ;;  %v3160_v34 = vunpack.i.l.bf16 %v3159_v54  ;;  %v3462_v54 = vpack.i.bf16 %v1427_v9, %v1426_v40 }
 0x462   : > { %v3154_v62 = vpop.permute.xlu1 %3153 }
 0x463   : > { %v3155_v30 = vunpack.i.l.bf16 %v3154_v62  ;;  %v3184_v63 = vpop.permute.xlu0 %3183  ;;  %v3156_v27 = vunpack.i.h.bf16 %v3154_v62  ;;  %v2359_v62 = vcombine.high %v5048_v52, %v5048_v52 }
 0x464   : > { %v3186_v11 = vunpack.i.h.bf16 %v3184_v63  ;;  %v3185_v38 = vunpack.i.l.bf16 %v3184_v63  ;;  %3438 = vrot.lane.b32.xlu1 %v5626_v49, %s3722_s24 }
 0x465   : > { %v5027_v7 = vsel %vm2208_vm13, %v3161_v36, %v3155_v30  ;;  %3468 = vrot.lane.b32.xlu0 %v5628_v39, %s3722_s24  ;;  %v3121_v36 = vunpack.i.h.bf16 %v4964_v43  ;;  %v5079_v46 = vsel %vm2208_vm13, %v3155_v30, %v3156_v27  ;;  %2499 = vmatprep.mubr.f32.mxu0 %v2359_v62  ;;  %v1388_v30 = vmul.f32 %v4361_v2, %v4490_v33 }
 0x466   : > { %v5035_v6 = vsel %vm2103_vm10, %v3140_v28, %v3185_v38  ;;  %v5037_v13 = vpop.permute.xlu1 %3168  ;;  %v5040_v18 = vsel %vm2103_vm10, %v3185_v38, %v3186_v11  ;;  %v1389_v28 = vmul.f32 %v4261_v59, %v4925_v32  ;;  %v3120_v11 = vunpack.i.l.bf16 %v4964_v43 }
 0x467   : > { %v3171_v17 = vunpack.i.h.bf16 %v5037_v13  ;;  %v3194_v3 = vpop.permute.xlu0 %3193  ;;  %v2991_v8 = vpack.c.bf16 %v5043_v16, %v5040_v18  ;;  %v3126_v43 = vunpack.i.h.bf16 %v4954_v0  ;;  %v2001_v27 = vsel %vm1998_vm12, %v3121_v36, %v3115_v19 }
 0x468   : > { %v3196_v48 = vunpack.i.h.bf16 %v3194_v3  ;;  %v3195_v29 = vunpack.i.l.bf16 %v3194_v3  ;;  %3453 = vrot.lane.b32.xlu1 %v5631_v61, %s3723_s26  ;;  %v3472_v62 = vpack.i.bf16 %v1389_v28, %v1388_v30  ;;  %v1436_v2 = vmul.f32 %v5627_v60, %v4796_v14 }
 0x469   : > { %v5066_v63 = vsel %vm1893_vm14, %v3171_v17, %v3165_v25  ;;  %3483 = vrot.lane.b32.xlu0 %v3482_v20, %s3721_s16  ;;  %v2002_v20 = vsel %vm1998_vm12, %v3115_v19, %v3116_v10  ;;  %v3131_v17 = vunpack.i.h.bf16 %v4974_v47  ;;  %v3130_v10 = vunpack.i.l.bf16 %v4974_v47  ;;  %v5635_v47 = vld [vmem:[#allocation32_spill] sm:$0xff]  ;;  %s2714_s16 = sshll.u32 %s3791_s9, 7  ;;  %s3724_s9 = smov [#allocation6]  }
 0x46a   : > { %v5073_v50 = vsel %vm2208_vm13, %v3160_v34, %v3195_v29  ;;  %v3174_v38 = vpop.permute.xlu1 %3173  ;;  %v5076_v35 = vsel %vm2208_vm13, %v3195_v29, %v3196_v48  ;;  %v5632_v34 = vld [vmem:[#allocation31_spill] sm:$0xff]  ;;  %v5633_v48 = vld [vmem:[#allocation30_spill] sm:$0xff]  ;;  %v5636_v30 = vpack.i.bf16 %v4762_v45, %v5635_v47  ;;  %v5638_v45 = vld [vmem:[#allocation33_spill] sm:$0xff]  ;;  %s5485_s10 = scalar_lea.hbm %s5537_s8, %s2714_s16  ;;  %s3640_s21 = sshll.u32 %s3724_s9, 4  ;;  %s3641_s21 = int_to_ptr.vmem [resolvable:$false] %s3640_s21 }
 0x46b   : > { %v3176_v40 = vunpack.i.h.bf16 %v3174_v38  ;;  %v3175_v9 = vunpack.i.l.bf16 %v3174_v38  ;;  %v5083_v39 = vpop.permute.xlu0 %3208  ;;  %v5634_v29 = vpack.i.bf16 %v5632_v34, %v5633_v48  ;;  %v1686_v28 = vsel %vm1683_vm15, %v3131_v17, %v3125_v1  ;;  %s3642_s23 = scalar_lea.vmem %s3641_s21, 256 }
 0x46c   : > { %3463 = vrot.lane.b32.xlu1 %v3462_v54, %s3722_s24 }
 0x46d   : > { %v1999_v3 = vsel %vm1998_vm12, %v3120_v11, %v3175_v9  ;;  %3488 = vrot.lane.b32.xlu0 %v5634_v29, %s3723_s26  ;;  %v2000_v0 = vsel %vm1998_vm12, %v3175_v9, %v3176_v40  ;;  %v1687_v11 = vsel %vm1683_vm15, %v3125_v1, %v3126_v43  ;;  %v1435_v40 = vmul.f32 %v5623_v55, %v4465_v56 }
 0x46e   : > { %v2977_v53 = vpack.c.bf16 %v2001_v27, %v1999_v3  ;;  %v3179_v61 = vpop.permute.xlu1 %3178  ;;  %v2975_v54 = vpack.c.bf16 %v2002_v20, %v2000_v0  ;;  %v3146_v9 = vunpack.i.h.bf16 %v4976_v5  ;;  %v3150_v56 = vunpack.i.l.bf16 %v4997_v42  ;;  %v5637_v0 = vld [vmem:[#allocation34_spill] sm:$0xff] }
 0x46f   : > { %v3181_v19 = vunpack.i.h.bf16 %v3179_v61  ;;  %v3180_v36 = vunpack.i.l.bf16 %v3179_v61  ;;  %v5104_v38 = vpop.permute.xlu0 %3213  ;;  %v3502_v34 = vpack.i.bf16 %v1436_v2, %v1435_v40  ;;  %v1607_v29 = vmul.f32 %v4273_v23, %v4925_v32 }
 0x470   : > { %3473 = vrot.lane.b32.xlu1 %v3472_v62, %s3720_s25  ;;  %2976 = vmatprep.subr.bf16.mxu0 %v2975_v54  ;;  %v5639_v61 = vpack.i.bf16 %v5637_v0, %v5638_v45  ;;  %v5138_v23 = vsel %vm1788_vm11, %v3145_v31, %v3146_v9  ;;  %v5641_v5 = vpack.i.bf16 %v4786_v51, %v4777_v37  ;;  %s2675_s25 = sshll.u32 %s3874_s22, 3 }
 0x471   : > { %v1684_v14 = vsel %vm1683_vm15, %v3130_v10, %v3180_v36  ;;  %3498 = vrot.lane.b32.xlu0 %v5636_v30, %s3723_s26  ;;  %2978 = vmatpush1.bf16.msra.mxu0 %v2977_v53  ;;  %v1685_v20 = vsel %vm1683_vm15, %v3180_v36, %v3181_v19  ;;  %v3166_v53 = vunpack.i.h.bf16 %v5002_v24  ;;  %v3170_v19 = vunpack.i.l.bf16 %v5037_v13 }
 0x472   : > { %v2913_v27 = vpack.c.bf16 %v1686_v28, %v1684_v14  ;;  %v3189_v3 = vpop.permute.xlu1 %3188  ;;  %v2911_v43 = vpack.c.bf16 %v1687_v11, %v1685_v20  ;;  %v5640_v28 = vld [vmem:[#allocation35_spill] sm:$0xff]  ;;  %v1433_v51 = vmul.f32 %v5627_v60, %v4925_v32  ;;  %v1432_v32 = vmul.f32 %v5623_v55, %v4490_v33 }
 0x473   : > { %v3191_v48 = vunpack.i.h.bf16 %v3189_v3  ;;  %v3190_v1 = vunpack.i.l.bf16 %v3189_v3  ;;  %v5119_v17 = vpop.permute.xlu0 %3228  ;;  %v3522_v14 = vpack.i.bf16 %v1607_v29, %v5640_v28  ;;  %v5162_v13 = vsel %vm1893_vm14, %v3165_v25, %v3166_v53  ;;  %v5173_v20 = vld [vmem:[%s5530_s1] sm:$0xff]  ;;  %v5642_v25 = vld [vmem:[#allocation36_spill] sm:$0xff] }
 0x474   : > { %3478 = vrot.lane.b32.xlu1 %v5639_v61, %s3722_s24  ;;  %2912 = vmatprep.subr.bf16.mxu1 %v2911_v43  ;;  %v2358_v24 = vcombine.high %v5173_v20, %v5173_v20  ;;  %v5643_v3 = vpack.i.bf16 %v4804_v57, %v5642_v25  ;;  %v3210_v29 = vunpack.i.l.bf16 %v5083_v39 }
 0x475   : > { %v5129_v62 = vsel %vm1788_vm11, %v3150_v56, %v3190_v1  ;;  %3503 = vrot.lane.b32.xlu0 %v3502_v34, %s3722_s24  ;;  %2914 = vmatpush1.bf16.msra.mxu1 %v2913_v27  ;;  %v5133_v42 = vsel %vm1788_vm11, %v3190_v1, %v3191_v48  ;;  %v3512_v56 = vpack.i.bf16 %v1433_v51, %v1432_v32  ;;  %v3211_v1 = vunpack.i.h.bf16 %v5083_v39  ;;  %v2349_v39 = vld [vmem:[%s5531_s2] sm:$0xf] }
 0x476   : > { %v3199_v2 = vpop.permute.xlu1 %3198  ;;  %2428 = vmatprep.mubr.f32.mxu1 %v2358_v24  ;;  %v3215_v32 = vunpack.i.l.bf16 %v5104_v38 }
 0x477   : > { %v3201_v36 = vunpack.i.h.bf16 %v3199_v2  ;;  %v3200_v11 = vunpack.i.l.bf16 %v3199_v2  ;;  %v5145_v40 = vpop.permute.xlu0 %3233 }
 0x478   : > { %3493 = vrot.lane.b32.xlu1 %v5641_v5, %s3723_s26 }
 0x479   : > { %v5153_v31 = vsel %vm1893_vm14, %v3170_v19, %v3200_v11  ;;  %3523 = vrot.lane.b32.xlu0 %v3522_v14, %s3723_s26  ;;  %v5157_v9 = vsel %vm1893_vm14, %v3200_v11, %v3201_v36  ;;  %v3235_v19 = vunpack.i.l.bf16 %v5145_v40 }
 0x47a   : > { %v3204_v30 = vpop.permute.xlu1 %3203 }
 0x47b   : > { %v3249_v27 = vpop.permute.xlu0 %3248  ;;  %v3206_v60 = vunpack.i.h.bf16 %v3204_v30  ;;  %v3205_v43 = vunpack.i.l.bf16 %v3204_v30 }
 0x47c   : > { %3508 = vrot.lane.b32.xlu1 %v5643_v3, %s3722_s24  ;;  %v3250_v28 = vunpack.i.l.bf16 %v3249_v27  ;;  %v3216_v3 = vunpack.i.h.bf16 %v5104_v38 }
 0x47d   : > { %3528 = vrot.lane.b32.xlu0 %v3527_v22, %s3723_s26  ;;  %v2005_v33 = vsel %vm1998_vm12, %v3211_v1, %v3205_v43  ;;  %v2006_v22 = vsel %vm1998_vm12, %v3205_v43, %v3206_v60 }
 0x47e   : > { %v3219_v34 = vpop.permute.xlu1 %3218 }
 0x47f   : > { %v3254_v48 = vpop.permute.xlu0 %3253  ;;  %v3221_v60 = vunpack.i.h.bf16 %v3219_v34 }
 0x480   : > { %v3256_v57 = vunpack.i.h.bf16 %v3254_v48  ;;  %v3255_v0 = vunpack.i.l.bf16 %v3254_v48  ;;  %3513 = vrot.lane.b32.xlu1 %v3512_v56, %s3722_s24  ;;  %s323_s24 = scalar_lea.vmem [#allocation6], %s2675_s25 }
 0x482   : > { %v2003_v55 = vsel %vm1998_vm12, %v3210_v29, %v3255_v0  ;;  %v5192_v12 = vpop.permute.xlu1 %3223  ;;  %v2004_v21 = vsel %vm1998_vm12, %v3255_v0, %v3256_v57  ;;  %v3220_v57 = vunpack.i.l.bf16 %v3219_v34 }
 0x483   : > { %v2981_v45 = vpack.c.bf16 %v2005_v33, %v2003_v55  ;;  %v5196_v61 = vpop.permute.xlu0 %3263  ;;  %v2979_v53 = vpack.c.bf16 %v2006_v22, %v2004_v21  ;;  %v1691_v55 = vsel %vm1683_vm15, %v3215_v32, %v3216_v3  ;;  %v3236_v21 = vunpack.i.h.bf16 %v5145_v40 }
 0x484   : > { %3518 = vrot.lane.b32.xlu1 %v3517_v58, %s3723_s26  ;;  %v3251_v58 = vunpack.i.h.bf16 %v3249_v27  ;;  %v1690_v22 = vsel %vm1683_vm15, %v3221_v60, %v3215_v32  ;;  %s2597_s26 = sshll.u32 %s323_s24, 4  ;;  %s5487_s26 = int_to_ptr.vmem [resolvable:$true] %s2597_s26 }
 0x485   : > { %2980 = vmatprep.subr.bf16.mxu0 %v2979_v53  ;;  %s3636_s13 = scalar_lea.vmem %s5487_s26, 128  ;;  %p3643_p8 = scmp.lt.s32.totalorder %s5487_s26, %s3641_s21 }
 0x486   : > { %v3239_v2 = vpop.permute.xlu1 %3238  ;;  %2982 = vmatpush1.bf16.msra.mxu0 %v2981_v45  ;;  %p3637_p6 = scmp.ne.s32.totalorder %s5487_s26, %s3636_s13  ;;  %p3644_p10 = scmp.lt.s32.totalorder %s3642_s23, %s3636_s13 }
 0x487   : > { %v3241_v36 = vunpack.i.h.bf16 %v3239_v2  ;;  %v3274_v11 = vpop.permute.xlu0 %3273 }
 0x488   : > { %v3275_v14 = vunpack.i.l.bf16 %v3274_v11  ;;  %2352 = vperm.xlu1 %3110, %v2349_v39   ;;  %v3276_v30 = vunpack.i.h.bf16 %v3274_v11  ;;  %p3638_p12 = pnand %p3637_p6, %p5656_p11  ;;  %p3645_p0 = por %p3644_p10, %p3643_p8 }
 0x489   : > { %v5207_v5 = vsel %vm1788_vm11, %v3241_v36, %v3235_v19 }
 0x48a   : > { %v5210_v44 = vsel %vm2208_vm13, %v3250_v28, %v3275_v14  ;;  %v3244_v41 = vpop.permute.xlu1 %3243  ;;  %v5218_v56 = vsel %vm2208_vm13, %v3275_v14, %v3276_v30  ;;  %v3240_v28 = vunpack.i.l.bf16 %v3239_v2  ;;  %p3639_p13 = pneg %p3638_p12 }
 0x48b   : > { %v3246_v51 = vunpack.i.h.bf16 %v3244_v41  ;;  %v3245_v24 = vunpack.i.l.bf16 %v3244_v41  ;;  %v3279_v25 = vpop.permute.xlu0 %3278 }
 0x48c   : > { %p3646_p2 = pnand %p3645_p0, %p3639_p13 }
 0x48d   : > { %v5215_v43 = vsel %vm2208_vm13, %v3251_v58, %v3245_v24  ;;  %v5221_v48 = vsel %vm2208_vm13, %v3245_v24, %v3246_v51  ;;  %v5241_v58 = vsel %vm1788_vm11, %v3235_v19, %v3236_v21  ;;  %v3281_v21 = vunpack.i.h.bf16 %v3279_v25 }
 0x48e   : > { %v3259_v1 = vpop.permute.xlu1 %3258 }
 0x48f   : > { %v3261_v0 = vunpack.i.h.bf16 %v3259_v1  ;;  %v3260_v38 = vunpack.i.l.bf16 %v3259_v1  ;;  %v3289_v33 = vpop.permute.xlu0 %3288 }
 0x491   : > { %v1688_v45 = vsel %vm1683_vm15, %v3220_v57, %v3260_v38  ;;  %v1689_v53 = vsel %vm1683_vm15, %v3260_v38, %v3261_v0 }
 0x492   : > { %v2917_v39 = vpack.c.bf16 %v1690_v22, %v1688_v45  ;;  %v3269_v36 = vpop.permute.xlu1 %3268  ;;  %v2915_v11 = vpack.c.bf16 %v1691_v55, %v1689_v53  ;;  %v3280_v22 = vunpack.i.l.bf16 %v3279_v25 }
 0x493   : > { %v3271_v14 = vunpack.i.h.bf16 %v3269_v36  ;;  %v3270_v30 = vunpack.i.l.bf16 %v3269_v36  ;;  %v5232_v34 = vpop.permute.xlu0 %3303 }
 0x494   : > { %2916 = vmatprep.subr.bf16.mxu1 %v2915_v11  ;;  %v2010_v47 = vsel %vm1998_vm12, %v3280_v22, %v3281_v21 }
 0x495   : > { %v5235_v41 = vsel %vm1788_vm11, %v3240_v28, %v3270_v30  ;;  %2918 = vmatpush1.bf16.msra.mxu1 %v2917_v39  ;;  %v5238_v40 = vsel %vm1788_vm11, %v3270_v30, %v3271_v14  ;;  %v3291_v14 = vunpack.i.h.bf16 %v3289_v33  ;;  %v3290_v30 = vunpack.i.l.bf16 %v3289_v33 }
 0x496   : > { %v3284_v24 = vpop.permute.xlu1 %3283 }
 0x497   : > { %v5247_v3 = vpop.permute.xlu0 %3308  ;;  %v3286_v45 = vunpack.i.h.bf16 %v3284_v24  ;;  %v3285_v39 = vunpack.i.l.bf16 %v3284_v24 }
 0x499   : > { %v2009_v37 = vsel %vm1998_vm12, %v3286_v45, %v3280_v22  ;;  %v1695_v45 = vsel %vm1683_vm15, %v3290_v30, %v3291_v14 }
 0x49a   : > { %v3294_v32 = vpop.permute.xlu1 %3293 }
 0x49b   : > { %v5249_v60 = vpop.permute.xlu0 %3323  ;;  %v3296_v51 = vunpack.i.h.bf16 %v3294_v32  ;;  %v3295_v29 = vunpack.i.l.bf16 %v3294_v32 }
 0x49d   : > { %v1694_v33 = vsel %vm1683_vm15, %v3296_v51, %v3290_v30  ;;  %v3226_v30 = vunpack.i.h.bf16 %v5192_v12 }
 0x49e   : > { %v5251_v1 = vpop.permute.xlu1 %3298 }
 0x49f   : > { %v5253_v57 = vpop.permute.xlu0 %3338 }
 0x4a0   : > { %v3340_v26 = vunpack.i.l.bf16 %v5253_v57 }
 0x4a2   : > { %v5255_v0 = vpop.permute.xlu1 %3313 }
 0x4a3   : > { %v5257_v19 = vpop.permute.xlu0 %3348 }
 0x4a6   : > { %v5259_v38 = vpop.permute.xlu1 %3318 }
 0x4a7   : > { %v3359_v55 = vpop.permute.xlu0 %3358 }
 0x4aa   : > { %v3329_v53 = vpop.permute.xlu1 %3328 }
 0x4ab   : > { %v3331_v36 = vunpack.i.h.bf16 %v3329_v53  ;;  %v3330_v11 = vunpack.i.l.bf16 %v3329_v53  ;;  %v5261_v28 = vpop.permute.xlu0 %3363 }
 0x4ad   : > { %v2007_v2 = vsel %vm1998_vm12, %v3285_v39, %v3330_v11  ;;  %v2008_v54 = vsel %vm1998_vm12, %v3330_v11, %v3331_v36 }
 0x4ae   : > { %v2985_v27 = vpack.c.bf16 %v2009_v37, %v2007_v2  ;;  %v3334_v25 = vpop.permute.xlu1 %3333  ;;  %v2983_v10 = vpack.c.bf16 %v2010_v47, %v2008_v54 }
 0x4af   : > { %v3336_v24 = vunpack.i.h.bf16 %v3334_v25  ;;  %v3335_v49 = vunpack.i.l.bf16 %v3334_v25  ;;  %v5267_v53 = vpop.permute.xlu0 %3378  ;;  %v3225_v25 = vunpack.i.l.bf16 %v5192_v12 }
 0x4b0   : > { %2984 = vmatprep.subr.bf16.mxu0 %v2983_v10 }
 0x4b1   : > { %v1692_v21 = vsel %vm1683_vm15, %v3295_v29, %v3335_v49  ;;  %2986 = vmatpush1.bf16.msra.mxu0 %v2985_v27  ;;  %v1693_v22 = vsel %vm1683_vm15, %v3335_v49, %v3336_v24  ;;  %v3361_v29 = vunpack.i.h.bf16 %v3359_v55  ;;  %v3360_v49 = vunpack.i.l.bf16 %v3359_v55 }
 0x4b2   : > { %v2921_v39 = vpack.c.bf16 %v1694_v33, %v1692_v21  ;;  %v5273_v36 = vpop.permute.xlu1 %3343  ;;  %v2919_v37 = vpack.c.bf16 %v1695_v45, %v1693_v22  ;;  %v3266_v24 = vunpack.i.h.bf16 %v5196_v61  ;;  %v3265_v33 = vunpack.i.l.bf16 %v5196_v61 }
 0x4b3   : > { %v5275_v54 = vpop.permute.xlu0 %3383  ;;  %v2111_v59 = vsel %vm2103_vm10, %v3225_v25, %v3226_v30  ;;  %v3301_v61 = vunpack.i.h.bf16 %v5251_v1 }
 0x4b4   : > { %2920 = vmatprep.subr.bf16.mxu1 %v2919_v37  ;;  %v2109_v12 = vsel %vm2103_vm10, %v3265_v33, %v3266_v24 }
 0x4b5   : > { %2922 = vmatpush1.bf16.msra.mxu1 %v2921_v39  ;;  %v2995_v24 = vpack.c.bf16 %v2111_v59, %v2109_v12  ;;  %v3380_v12 = vunpack.i.l.bf16 %v5267_v53 }
 0x4b6   : > { %v3354_v47 = vpop.permute.xlu1 %3353 }
 0x4b7   : > { %v5277_v2 = vpop.permute.xlu0 %3398  ;;  %v3356_v10 = vunpack.i.h.bf16 %v3354_v47  ;;  %v3355_v51 = vunpack.i.l.bf16 %v3354_v47 }
 0x4b9   : > { %v2013_v21 = vsel %vm1998_vm12, %v3361_v29, %v3355_v51  ;;  %v2014_v37 = vsel %vm1998_vm12, %v3355_v51, %v3356_v10  ;;  %v3300_v29 = vunpack.i.l.bf16 %v5251_v1  ;;  %v3231_v10 = vunpack.i.h.bf16 %v5119_v17 }
 0x4ba   : > { %v5279_v32 = vpop.permute.xlu1 %3368  ;;  %v3230_v51 = vunpack.i.l.bf16 %v5119_v17  ;;  %v5644_v17 = vpack.c.bf16 %v4991_v4, %v5035_v6 }
 0x4bb   : > { %v3404_v27 = vpop.permute.xlu0 %3403  ;;  %v2110_v30 = vsel %vm2103_vm10, %v3231_v10, %v3225_v25  ;;  %v2115_v18 = vsel %vm2103_vm10, %v3300_v29, %v3301_v61 }
 0x4bc   : > { %v3406_v11 = vunpack.i.h.bf16 %v3404_v27  ;;  %v3405_v14 = vunpack.i.l.bf16 %v3404_v27  ;;  %v2108_v1 = vsel %vm2103_vm10, %v3230_v51, %v3265_v33 }
 0x4be   : > { %v2011_v22 = vsel %vm1998_vm12, %v3360_v49, %v3405_v14  ;;  %v3374_v45 = vpop.permute.xlu1 %3373  ;;  %v2012_v39 = vsel %vm1998_vm12, %v3405_v14, %v3406_v11  ;;  %v3341_v49 = vunpack.i.h.bf16 %v5253_v57  ;;  %v3306_v57 = vunpack.i.h.bf16 %v5232_v34 }
 0x4bf   : > { %v2989_v55 = vpack.c.bf16 %v2013_v21, %v2011_v22  ;;  %v5289_v47 = vpop.permute.xlu0 %3408  ;;  %v2987_v27 = vpack.c.bf16 %v2014_v37, %v2012_v39  ;;  %v3305_v21 = vunpack.i.l.bf16 %v5232_v34  ;;  %v3376_v34 = vunpack.i.h.bf16 %v3374_v45 }
 0x4c0   : > { %v2113_v39 = vsel %vm2103_vm10, %v3340_v26, %v3341_v49  ;;  %v2114_v59 = vsel %vm2103_vm10, %v3306_v57, %v3300_v29  ;;  %v3375_v37 = vunpack.i.l.bf16 %v3374_v45  ;;  %v3321_v57 = vunpack.i.h.bf16 %v5259_v38 }
 0x4c1   : > { %2988 = vmatprep.subr.bf16.mxu0 %v2987_v27  ;;  %v2112_v25 = vsel %vm2103_vm10, %v3305_v21, %v3340_v26  ;;  %v2999_v33 = vpack.c.bf16 %v2115_v18, %v2113_v39  ;;  %v3381_v27 = vunpack.i.h.bf16 %v5267_v53  ;;  %v3320_v53 = vunpack.i.l.bf16 %v5259_v38 }
 0x4c2   : > { %v5297_v11 = vpop.permute.xlu1 %3388  ;;  %2990 = vmatpush1.bf16.msra.mxu0 %v2989_v55  ;;  %v3001_v4 = vpack.c.bf16 %v2114_v59, %v2112_v25  ;;  %v2119_v51 = vsel %vm2103_vm10, %v3375_v37, %v3376_v34  ;;  %v3366_v21 = vunpack.i.h.bf16 %v5261_v28  ;;  %v3371_v39 = vunpack.i.h.bf16 %v5279_v32 }
 0x4c3   : > { %v5301_v14 = vpop.permute.xlu0 %3418  ;;  %2992 = vmatprep.subr.bf16.mxu0 %v2991_v8  ;;  %v2997_v8 = vpack.c.bf16 %v2110_v30, %v2108_v1  ;;  %v2118_v10 = vsel %vm2103_vm10, %v3381_v27, %v3375_v37  ;;  %v3311_v18 = vunpack.i.h.bf16 %v5247_v3  ;;  %v3326_v59 = vunpack.i.h.bf16 %v5249_v60 }
 0x4c4   : > { %v3351_v25 = vunpack.i.h.bf16 %v5257_v19  ;;  %v3350_v34 = vunpack.i.l.bf16 %v5257_v19  ;;  %v3370_v38 = vunpack.i.l.bf16 %v5279_v32  ;;  %v3316_v27 = vunpack.i.h.bf16 %v5255_v0 }
 0x4c6   : > { %v5310_v22 = vpop.permute.xlu1 %3393  ;;  %2994 = vmatpush1.bf16.msra.mxu0 %v5644_v17  ;;  %v3365_v17 = vunpack.i.l.bf16 %v5261_v28 }
 0x4c7   : > { %v5317_v16 = vpop.permute.xlu0 %3428  ;;  %2996 = vmatprep.subr.bf16.mxu0 %v2995_v24 }
 0x4c8   : > { %v1698_v19 = vsel %vm1683_vm15, %v3371_v39, %v3365_v17  ;;  %v3395_v39 = vunpack.i.l.bf16 %v5310_v22 }
 0x4ca   : > { %v5321_v55 = vpop.permute.xlu1 %3413  ;;  %2998 = vmatpush1.bf16.msra.mxu0 %v2997_v8  ;;  %v3310_v8 = vunpack.i.l.bf16 %v5247_v3  ;;  %v3325_v3 = vunpack.i.l.bf16 %v5249_v60 }
 0x4cb   : > { %v3444_v6 = vpop.permute.xlu0 %3443  ;;  %3000 = vmatprep.subr.bf16.mxu0 %v2999_v33 }
 0x4cc   : > { %v3446_v61 = vunpack.i.h.bf16 %v3444_v6  ;;  %v3445_v49 = vunpack.i.l.bf16 %v3444_v6  ;;  %v5645_v6 = vpack.c.bf16 %v5079_v46, %v5076_v35  ;;  %v3346_v35 = vunpack.i.h.bf16 %v5273_v36 }
 0x4ce   : > { %v2116_v29 = vsel %vm2103_vm10, %v3380_v12, %v3445_v49  ;;  %v5327_v26 = vpop.permute.xlu1 %3423  ;;  %3002 = vmatpush1.bf16.msra.mxu0 %v3001_v4  ;;  %v2117_v45 = vsel %vm2103_vm10, %v3445_v49, %v3446_v61  ;;  %v3345_v12 = vunpack.i.l.bf16 %v5273_v36  ;;  %v2220_v61 = vsel %vm2208_vm13, %v3320_v53, %v3321_v57 }
 0x4cf   : > { %v3005_v30 = vpack.c.bf16 %v2118_v10, %v2116_v29  ;;  %v5331_v1 = vpop.permute.xlu0 %3448  ;;  %v3003_v24 = vpack.c.bf16 %v2119_v51, %v2117_v45  ;;  %v1699_v10 = vsel %vm1683_vm15, %v3365_v17, %v3366_v21  ;;  %v3315_v29 = vunpack.i.l.bf16 %v5255_v0 }
 0x4d0   : > { %v5646_v45 = vpack.c.bf16 %v5027_v7, %v5073_v50  ;;  %v5647_v57 = vpack.c.bf16 %v5221_v48, %v5218_v56  ;;  %v2218_v0 = vsel %vm2208_vm13, %v3350_v34, %v3351_v25  ;;  %v1800_v36 = vsel %vm1788_vm11, %v3310_v8, %v3311_v18 }
 0x4d1   : > { %3004 = vmatprep.subr.bf16.mxu0 %v3003_v24  ;;  %v5373_v21 = vsel %vm1788_vm11, %v3316_v27, %v3310_v8  ;;  %v2217_v7 = vsel %vm2208_vm13, %v3325_v3, %v3350_v34  ;;  %v5377_v50 = vsel %vm1788_vm11, %v3315_v29, %v3345_v12  ;;  %v3396_v17 = vunpack.i.h.bf16 %v5310_v22 }
 0x4d2   : > { %v3434_v33 = vpop.permute.xlu1 %3433  ;;  %3006 = vmatpush1.bf16.msra.mxu0 %v3005_v30  ;;  %v2219_v30 = vsel %vm2208_vm13, %v3326_v59, %v3320_v53  ;;  %v3015_v53 = vpack.c.bf16 %v2220_v61, %v2218_v0  ;;  %v3416_v56 = vunpack.i.h.bf16 %v5321_v55  ;;  %v3415_v48 = vunpack.i.l.bf16 %v5321_v55 }
 0x4d3   : > { %v3436_v37 = vunpack.i.h.bf16 %v3434_v33  ;;  %v3435_v4 = vunpack.i.l.bf16 %v3434_v33  ;;  %v5344_v28 = vpop.permute.xlu0 %3458  ;;  %3008 = vmatprep.subr.bf16.mxu0 %v5645_v6  ;;  %v3017_v18 = vpack.c.bf16 %v2219_v30, %v2217_v7  ;;  %v3386_v8 = vunpack.i.h.bf16 %v5275_v54 }
 0x4d4   : > { %v3385_v59 = vunpack.i.l.bf16 %v5275_v54  ;;  %v5648_v33 = vpack.c.bf16 %v5138_v23, %v5133_v42  ;;  %v5649_v34 = vpack.c.bf16 %v5215_v43, %v5210_v44  ;;  %v1798_v22 = vsel %vm1788_vm11, %v3345_v12, %v3346_v35 }
 0x4d5   : > { %v1696_v32 = vsel %vm1683_vm15, %v3370_v38, %v3435_v4  ;;  %v1697_v49 = vsel %vm1683_vm15, %v3435_v4, %v3436_v37  ;;  %v2937_v55 = vpack.c.bf16 %v5373_v21, %v5377_v50  ;;  %v3401_v38 = vunpack.i.h.bf16 %v5277_v2 }
 0x4d6   : > { %v2925_v46 = vpack.c.bf16 %v1698_v19, %v1696_v32  ;;  %v5359_v60 = vpop.permute.xlu1 %3438  ;;  %3010 = vmatpush1.bf16.msra.mxu0 %v5646_v45  ;;  %v2923_v51 = vpack.c.bf16 %v1699_v10, %v1697_v49  ;;  %v3400_v37 = vunpack.i.l.bf16 %v5277_v2  ;;  %v3411_v54 = vunpack.i.h.bf16 %v5289_v47 }
 0x4d7   : > { %v5365_v24 = vpop.permute.xlu0 %3468  ;;  %3012 = vmatprep.subr.bf16.mxu0 %v5647_v57  ;;  %v3410_v42 = vunpack.i.l.bf16 %v5289_v47  ;;  %v3391_v23 = vunpack.i.h.bf16 %v5297_v11  ;;  %v3420_v43 = vunpack.i.l.bf16 %v5301_v14  ;;  %v2223_v3 = vsel %vm2208_vm13, %v3401_v38, %v3395_v39 }
 0x4d8   : > { %2924 = vmatprep.subr.bf16.mxu1 %v2923_v51  ;;  %v5650_v27 = vpack.c.bf16 %v5008_v15, %v5129_v62  ;;  %v2224_v2 = vsel %vm2208_vm13, %v3395_v39, %v3396_v17  ;;  %v2317_v12 = vsel %vm2313_vm1, %v3415_v48, %v3416_v56  ;;  %v5651_v49 = vpack.c.bf16 %v5241_v58, %v5238_v40 }
 0x4d9   : > { %2926 = vmatpush1.bf16.msra.mxu1 %v2925_v46  ;;  %v3421_v15 = vunpack.i.h.bf16 %v5301_v14  ;;  %v2935_v46 = vpack.c.bf16 %v1800_v36, %v1798_v22  ;;  %v3451_v45 = vunpack.i.h.bf16 %v5331_v1  ;;  %v3450_v51 = vunpack.i.l.bf16 %v5331_v1 }
 0x4da   : > { %v3454_v25 = vpop.permute.xlu1 %3453  ;;  %2928 = vmatprep.subr.bf16.mxu1 %v5648_v33  ;;  %3014 = vmatpush1.bf16.msra.mxu0 %v5649_v34  ;;  %v2315_v30 = vsel %vm2313_vm1, %v3410_v42, %v3411_v54  ;;  %v1804_v57 = vsel %vm1788_vm11, %v3385_v59, %v3386_v8  ;;  %v3390_v40 = vunpack.i.l.bf16 %v5297_v11  ;;  %v1803_v58 = vsel %vm1788_vm11, %v3391_v23, %v3385_v59 }
 0x4db   : > { %v3484_v4 = vpop.permute.xlu0 %3483  ;;  %3016 = vmatprep.subr.bf16.mxu0 %v3015_v53  ;;  %v3456_v61 = vunpack.i.h.bf16 %v3454_v25  ;;  %v3455_v19 = vunpack.i.l.bf16 %v3454_v25  ;;  %v2316_v0 = vsel %vm2313_vm1, %v3421_v15, %v3415_v48  ;;  %v5652_v14 = vpack.c.bf16 %v5207_v5, %v5235_v41 }
 0x4dc   : > { %v3486_v6 = vunpack.i.h.bf16 %v3484_v4  ;;  %v3485_v44 = vunpack.i.l.bf16 %v3484_v4  ;;  %v3023_v36 = vpack.c.bf16 %v2317_v12, %v2315_v30  ;;  %v2314_v21 = vsel %vm2313_vm1, %v3420_v43, %v3410_v42 }
 0x4dd   : > { %2930 = vmatpush1.bf16.msra.mxu1 %v5650_v27  ;;  %v3426_v1 = vunpack.i.h.bf16 %v5327_v26  ;;  %v3461_v7 = vunpack.i.h.bf16 %v5344_v28  ;;  %v2321_v11 = vsel %vm2313_vm1, %v3455_v19, %v3456_v61  ;;  %v3425_v53 = vunpack.i.l.bf16 %v5327_v26 }
 0x4de   : > { %v2221_v47 = vsel %vm2208_vm13, %v3400_v37, %v3485_v44  ;;  %v5407_v32 = vpop.permute.xlu1 %3463  ;;  %2932 = vmatprep.subr.bf16.mxu1 %v5651_v49  ;;  %3018 = vmatpush1.bf16.msra.mxu0 %v3017_v18  ;;  %v2222_v10 = vsel %vm2208_vm13, %v3485_v44, %v3486_v6  ;;  %v3460_v17 = vunpack.i.l.bf16 %v5344_v28  ;;  %v3431_v56 = vunpack.i.h.bf16 %v5317_v16 }
 0x4df   : > { %v3021_v62 = vpack.c.bf16 %v2223_v3, %v2221_v47  ;;  %v5414_v29 = vpop.permute.xlu0 %3488  ;;  %v3019_v35 = vpack.c.bf16 %v2224_v2, %v2222_v10  ;;  %v3025_v48 = vpack.c.bf16 %v2316_v0, %v2314_v21  ;;  %v2320_v18 = vsel %vm2313_vm1, %v3461_v7, %v3455_v19 }
 0x4e0   : > { %v2319_v8 = vsel %vm2313_vm1, %v3450_v51, %v3451_v45  ;;  %v3430_v59 = vunpack.i.l.bf16 %v5317_v16  ;;  %v5653_v38 = vmov 0.0   ;;  %v2318_v37 = vsel %vm2313_vm1, %v3460_v17, %v3450_v51 }
 0x4e1   : > { %2934 = vmatpush1.bf16.msra.mxu1 %v5652_v14  ;;  %3020 = vmatprep.subr.bf16.mxu0 %v3019_v35  ;;  %v3027_v26 = vpack.c.bf16 %v2321_v11, %v2319_v8  ;;  %v3440_v54 = vunpack.i.l.bf16 %v5359_v60  ;;  %v1899_v16 = vsel %vm1893_vm14, %v3425_v53, %v3426_v1  ;;  %v3466_v42 = vunpack.i.h.bf16 %v5407_v32 }
 0x4e2   : > { %v3474_v50 = vpop.permute.xlu1 %3473  ;;  %2936 = vmatprep.subr.bf16.mxu1 %v2935_v46  ;;  %3022 = vmatpush1.bf16.msra.mxu0 %v3021_v62  ;;  %v3465_v23 = vunpack.i.l.bf16 %v5407_v32  ;;  %v3491_v6 = vunpack.i.h.bf16 %v5414_v29  ;;  %v3490_v44 = vunpack.i.l.bf16 %v5414_v29  ;;  %v1901_v3 = vsel %vm1893_vm14, %v3430_v59, %v3431_v56 }
 0x4e3   : > { %v3476_v39 = vunpack.i.h.bf16 %v3474_v50  ;;  %v3475_v5 = vunpack.i.l.bf16 %v3474_v50  ;;  %v3499_v41 = vpop.permute.xlu0 %3498  ;;  %3024 = vmatprep.subr.bf16.mxu0 %v3023_v36  ;;  %v3471_v27 = vunpack.i.h.bf16 %v5365_v24  ;;  %v3470_v2 = vunpack.i.l.bf16 %v5365_v24 }
 0x4e4   : > { %v3500_v43 = vunpack.i.l.bf16 %v3499_v41  ;;  %v2947_v61 = vpack.c.bf16 %v1901_v3, %v1899_v16  ;;  %v1898_v19 = vsel %vm1893_vm14, %v3440_v54, %v3425_v53  ;;  %v3501_v47 = vunpack.i.h.bf16 %v3499_v41 }
 0x4e5   : > { %v1801_v25 = vsel %vm1788_vm11, %v3390_v40, %v3475_v5  ;;  %2938 = vmatpush1.bf16.msra.mxu1 %v2937_v55  ;;  %2500 = vmatmul.mubr.f32.vlgmr.msra.gmra.mrb[12].mxu0 %v5048_v52  ;;  %v1802_v28 = vsel %vm1788_vm11, %v3475_v5, %v3476_v39  ;;  %v3441_v55 = vunpack.i.h.bf16 %v5359_v60  ;;  %v3029_v52 = vpack.c.bf16 %v2320_v18, %v2318_v37 }
 0x4e6   : > { %v2941_v33 = vpack.c.bf16 %v1803_v58, %v1801_v25  ;;  %v3479_v34 = vpop.permute.xlu1 %3478  ;;  %3026 = vmatpush1.bf16.msra.mxu0 %v3025_v48  ;;  %v2939_v22 = vpack.c.bf16 %v1804_v57, %v1802_v28  ;;  %2570 = vmatprep.mubr.f32.mxu0 %v5653_v38  ;;  %v5654_v60 = vpack.c.bf16 %v5162_v13, %v5157_v9 }
 0x4e7   : > { %v3504_v4 = vpop.permute.xlu0 %3503  ;;  %3028 = vmatprep.subr.bf16.mxu0 %v3027_v26  ;;  %v1900_v10 = vsel %vm1893_vm14, %v3441_v55, %v3430_v59  ;;  %v3481_v15 = vunpack.i.h.bf16 %v3479_v34  ;;  %v3480_v62 = vunpack.i.l.bf16 %v3479_v34  ;;  %v1903_v35 = vsel %vm1893_vm14, %v3465_v23, %v3466_v42  ;;  %v2348_v55 = vld [vmem:[%s5530_s1 + $0x10] sm:$0xf] }
 0x4e8   : > { %2940 = vmatprep.subr.bf16.mxu1 %v2939_v22  ;;  %v2322_v24 = vsel %vm2313_vm1, %v3500_v43, %v3490_v44  ;;  %v5655_v9 = vpack.c.bf16 %v5066_v63, %v5153_v31  ;;  %v2323_v13 = vsel %vm2313_vm1, %v3490_v44, %v3491_v6  ;;  %v1905_v40 = vsel %vm1893_vm14, %v3470_v2, %v3471_v27 }
 0x4e9   : > { %2942 = vmatpush1.bf16.msra.mxu1 %v2941_v33  ;;  %v2949_v58 = vpack.c.bf16 %v1900_v10, %v1898_v19  ;;  %v2951_v0 = vpack.c.bf16 %v1905_v40, %v1903_v35  ;;  %v1902_v14 = vsel %vm1893_vm14, %v3480_v62, %v3465_v23  ;;  %v1904_v36 = vsel %vm1893_vm14, %v3481_v15, %v3470_v2 }
 0x4ea   : > { %v3494_v12 = vpop.permute.xlu1 %3493  ;;  %2944 = vmatprep.subr.bf16.mxu1 %v5654_v60  ;;  %3030 = vmatpush1.bf16.msra.mxu0 %v3029_v52  ;;  %v3506_v21 = vunpack.i.h.bf16 %v3504_v4  ;;  %v3505_v1 = vunpack.i.l.bf16 %v3504_v4  ;;  %v2953_v50 = vpack.c.bf16 %v1904_v36, %v1902_v14 }
 0x4eb   : > { %v3496_v32 = vunpack.i.h.bf16 %v3494_v12  ;;  %v3495_v49 = vunpack.i.l.bf16 %v3494_v12  ;;  %v3524_v29 = vpop.permute.xlu0 %3523 }
 0x4ec   : > { %v3526_v39 = vunpack.i.h.bf16 %v3524_v29  ;;  %v3525_v5 = vunpack.i.l.bf16 %v3524_v29  ;;  %v1909_v41 = vsel %vm1893_vm14, %v3505_v1, %v3506_v21 }
 0x4ed   : > { %v2324_v46 = vsel %vm2313_vm1, %v3501_v47, %v3495_v49  ;;  %2946 = vmatpush1.bf16.msra.mxu1 %v5655_v9  ;;  %v2325_v45 = vsel %vm2313_vm1, %v3495_v49, %v3496_v32 }
 0x4ee   : > { %v3033_v51 = vpack.c.bf16 %v2324_v46, %v2322_v24  ;;  %v3509_v30 = vpop.permute.xlu1 %3508  ;;  %2948 = vmatprep.subr.bf16.mxu1 %v2947_v61  ;;  %v3031_v57 = vpack.c.bf16 %v2325_v45, %v2323_v13  ;;  %v2327_v37 = vsel %vm2313_vm1, %v3525_v5, %v3526_v39 }
 0x4ef   : > { %v3511_v63 = vunpack.i.h.bf16 %v3509_v30  ;;  %v3529_v31 = vpop.permute.xlu0 %3528  ;;  %v3510_v11 = vunpack.i.l.bf16 %v3509_v30 }
 0x4f0   : > { %3032 = vmatprep.subr.bf16.mxu0 %v3031_v57  ;;  %v3530_v48 = vunpack.i.l.bf16 %v3529_v31  ;;  %v3531_v28 = vunpack.i.h.bf16 %v3529_v31 }
 0x4f1   : > { %2950 = vmatpush1.bf16.msra.mxu1 %v2949_v58  ;;  %3034 = vmatpush1.bf16.msra.mxu0 %v3033_v51  ;;  %v1908_v56 = vsel %vm1893_vm14, %v3511_v63, %v3505_v1 }
 0x4f2   : > { %v3514_v7 = vpop.permute.xlu1 %3513  ;;  %2952 = vmatprep.subr.bf16.mxu1 %v2951_v0  ;;  %v2326_v22 = vsel %vm2313_vm1, %v3530_v48, %v3525_v5 }
 0x4f3   : > { %v3516_v53 = vunpack.i.h.bf16 %v3514_v7  ;;  %v3515_v17 = vunpack.i.l.bf16 %v3514_v7 }
 0x4f5   : > { %v1906_v18 = vsel %vm1893_vm14, %v3510_v11, %v3515_v17  ;;  %2954 = vmatpush1.bf16.msra.mxu1 %v2953_v50  ;;  %v1907_v8 = vsel %vm1893_vm14, %v3515_v17, %v3516_v53 }
 0x4f6   : > { %v2957_v59 = vpack.c.bf16 %v1908_v56, %v1906_v18  ;;  %v3519_v25 = vpop.permute.xlu1 %3518  ;;  %v2955_v26 = vpack.c.bf16 %v1909_v41, %v1907_v8 }
 0x4f7   : > { %v3521_v33 = vunpack.i.h.bf16 %v3519_v25  ;;  %v3520_v34 = vunpack.i.l.bf16 %v3519_v25 }
 0x4f8   : > { %2956 = vmatprep.subr.bf16.mxu1 %v2955_v26 }
 0x4f9   : > { %v2328_v38 = vsel %vm2313_vm1, %v3531_v28, %v3520_v34  ;;  %2958 = vmatpush1.bf16.msra.mxu1 %v2957_v59  ;;  %v2329_v54 = vsel %vm2313_vm1, %v3520_v34, %v3521_v33 }
 0x4fa   : > { %v3037_v4 = vpack.c.bf16 %v2328_v38, %v2326_v22  ;;  %v3035_v16 = vpack.c.bf16 %v2329_v54, %v2327_v37 }
 0x4fc   : > { %2429 = vmatmul.mubr.f32.vlgmr.msra.gmra.mrb[12].mxu1 %v5173_v20  ;;  %3036 = vmatprep.subr.bf16.mxu0 %v3035_v16 }
 0x4fd   : > { %3038 = vmatpush1.bf16.msra.mxu0 %v3037_v4 }
 0x500   : > { %2707 = vmatmul.mubr.msk.f32.vlgmr.msra.gmra.mrb[12].mxu0 %vm416_vm0, %v2348_v55 }
 0x507   : > { %v2353_v23 = vpop.permute.xlu1 %2352 }
 0x5cf   : > { %v2430_v52 = vpop.f32.mrb[12].mxu1 }
 0x5d0   : > { %v2432_v42 = vpop.f32.mrb[13].mxu1  ;;  %v2431_v6 = vadd.f32 %v2430_v52, %v2353_v23 }
 0x5d1   : > { %v2433_v44 = vadd.f32 %v2432_v42, %v2353_v23 }
 0x5d3   : > { %v2572_v43 = vpop.f32.mrb[12].mxu0 }
 0x5d4   : > { %v3040_v3 = vadd.f32 %v2572_v43, %v2431_v6  ;;  %v2574_v27 = vpop.f32.mrb[13].mxu0 }
 0x5d5   : > { %v3042_v20 = vadd.f32 %v2574_v27, %v2433_v44 }
 0x5d7   : > { %v2579_v2 = vcombine.low %v3040_v3, %v3042_v20 }
 0x5d9   : > { %2581 = vst [vmem:[%s323_s24] sm:$0xff] %v2579_v2 }
 0x5da   : > { %3649 = shalt.err (!%p3646_p2)
}
 0x5db   : > { %s3650_s22 = scalar_lea.hbm %s5485_s10, 128  ;;  %s3654_s16 = scalar_lea.hbm %s5537_s8, 256 }
 0x5dc   : > { %p3651_p4 = scmp.ne.s32.totalorder %s5485_s10, %s3650_s22  ;;  %p3655_p9 = scmp.lt.u32.totalorder %s5485_s10, %s5537_s8 }
 0x5dd   : > { %p3656_p1 = scmp.lt.u32.totalorder %s3654_s16, %s3650_s22  ;;  %p3658_p6 = scmp.lt.u32.totalorder %s3650_s22, %s5485_s10 }
 0x5de   : > { %p3652_p5 = pnand %p3651_p4, %p5656_p11 }
 0x5df   : > { %p3657_p3 = por %p3656_p1, %p3655_p9 }
 0x5e0   : > { %p3653_p7 = pneg %p3652_p5 }
 0x5e1   : > { %p3659_p12 = por %p3658_p6, %p3657_p3 }
 0x5e3   : > { %p3660_p13 = pnand %p3659_p12, %p3653_p7 }
 0x5e5   : > { %3663 = shalt.err (!%p3660_p13)
}
 0x5e6   : > { %3047 = dma.vmem_to_hbm [thread:$0]  (%p5656_p11), %s5487_s26, 128, %s5485_s10, %s2583_s15  }
 0x5e7 PF: > { %s2609_s20 = sand.u32 1, %s3690_s27   ;;  %p5657_p8 = scmp.ne.s32.totalorder %s5568_s18, 0 }
 0x5e8   : > { %p5658_p10 = scmp.ge.s32.totalorder %s3702_s30, 2  ;;  %s2610_s13 = scalar_lea.sflag [#allocation5], %s2609_s20 }
 0x5ea   : > { %p3054_p0 = pnand %p5658_p10, %p5657_p8 }
 0x5ec   : > { %3685 = dma.done.wait (!%p3054_p0), %s2610_s13, 128  }
 0x5ed   : > { %3687 = vsyncadd (!%p3054_p0), %s2610_s13, 4294967168  ;;  %p21_p2 = scmp.ge.s32.totalorder %s3795_s11, 4   ;;  %s5659_s27 = smov %s3694_s28 }
 0x5ee   : > { %s5660_s28 = smov %s3698_s29  ;;  %s5661_s29 = smov %s3807_s14 }
 0x5ef   : > { %s5662_s30 = smov %s3795_s11  ;;  %23 = sbr.rel (!%p21_p2) target bundleno = 5 (0x5), region = 104 }
 0x5f6   :  { %2615 = vsyncpa [#allocation4], 1 }
 0x5f7   :  { %2617 = vsyncpa [#allocation4 + $0x1], 1 }
 0x5f8   :  { %2618 = vsyncpa [#allocation5], 1 }
 0x5f9   :  { %2620 = vsyncpa [#allocation5 + $0x1], 1 }

</bundles_post_ra>
